<compile_context>
chip_gen: v5e
topology: v5e:2x2
jax: 0.10.0
libtpu: 0.0.40
codegen_flags: <defaults>
</compile_context>

<pallas_src>
import math
import jax
import jax.numpy as jnp
from jax.experimental import pallas as pl
from jax.experimental.pallas import tpu as pltpu

# ---------------- torchaudio-equivalent constants ------------------------------
SAMPLE_RATE = 16000
N_FFT = 512
WIN_LENGTH = 400
HOP_LENGTH = 160
N_FREQS = N_FFT // 2 + 1          # 257 (onesided)
MEL_BANKS = (20, 40, 80)
N_MELS_TOTAL = sum(MEL_BANKS)     # 140

FP = 256                          # freq bins kept in-kernel (Nyquist fb row is 0)
MP = 256                          # mel columns padded 140 -> 256 (lane aligned)

MAX_TT = 1024                     # time-tile cap (per perf review; VMEM-safe on v7x)
N_SEG = 2                         # parallel time segments (feeds both v7x TCs)


# ---------------- constant construction (glue) ----------------------------------
def hamming_window_periodic(win_length):
    # TODO(synk): torchaudio MelSpectrogram defaults to Hann; this module's
    # MelSTFTLoss is assumed to use a periodic Hamming window (kept from the
    # previous, validated revision) -- confirm against the actual config.
    n = jnp.arange(win_length, dtype=jnp.float32)
    return 0.54 - 0.46 * jnp.cos(2.0 * math.pi * n / win_length)


def padded_window():
    # torch.stft zero-pads the window (centered) to n_fft when win_length < n_fft
    w = hamming_window_periodic(WIN_LENGTH)
    left = (N_FFT - WIN_LENGTH) // 2
    right = N_FFT - WIN_LENGTH - left
    return jnp.pad(w, (left, right))


def dft_matrix_bf16():
    # Combined cos|sin DFT with the window folded in.  Columns [0:FP] -> re,
    # [FP:2*FP] -> im, frequencies 0..255 (Nyquist dropped; see filterbank).
    win = padded_window()                                        # (512,)
    n = jnp.arange(N_FFT, dtype=jnp.float32)[:, None]            # (512, 1)
    f = jnp.arange(FP, dtype=jnp.float32)[None, :]               # (1, 256)
    ang = 2.0 * math.pi * n * f / N_FFT
    cos_m = win[:, None] * jnp.cos(ang)
    sin_m = win[:, None] * jnp.sin(ang)
    return jnp.concatenate([cos_m, sin_m], axis=1).astype(jnp.bfloat16)  # (512, 512)


def mel_filterbank(n_mels):
    # torchaudio melscale_fbanks: htk scale, norm=None, f_min=0, f_max=sr/2
    all_freqs = jnp.linspace(0.0, SAMPLE_RATE / 2, N_FREQS)

    def hz_to_mel(fhz):
        return 2595.0 * math.log10(1.0 + fhz / 700.0)

    def mel_to_hz(m):
        return 700.0 * (10.0 ** (m / 2595.0) - 1.0)

    m_min = hz_to_mel(0.0)
    m_max = hz_to_mel(SAMPLE_RATE / 2.0)
    m_pts = jnp.linspace(m_min, m_max, n_mels + 2)
    f_pts = mel_to_hz(m_pts)
    f_diff = f_pts[1:] - f_pts[:-1]
    slopes = f_pts[None, :] - all_freqs[:, None]                 # (257, n_mels+2)
    down = -slopes[:, :-2] / f_diff[:-1]
    up = slopes[:, 2:] / f_diff[1:]
    fb = jnp.maximum(0.0, jnp.minimum(down, up))                 # (257, n_mels)
    return fb.astype(jnp.float32)


def combined_filterbank_bf16():
    fb = jnp.concatenate([mel_filterbank(m) for m in MEL_BANKS], axis=1)  # (257, 140)
    fb = fb[:FP]                                 # Nyquist row is exactly 0 (HTK, norm=None)
    fb = jnp.pad(fb, ((0, 0), (0, MP - N_MELS_TOTAL)))                    # (256, 256)
    return fb.astype(jnp.bfloat16)


def build_frames(clean, enhanced):
    """Stack clean/enhanced, reflect-pad (center=True), frame WITHOUT a gather,
    pad the time axis to N_SEG * n_t * tT."""
    B, L = clean.shape
    pad = N_FFT // 2
    w = jnp.stack([clean, enhanced], axis=1)                     # (B, 2, L)
    wp = jnp.pad(w, ((0, 0), (0, 0), (pad, pad)), mode="reflect")
    wp = wp.astype(jnp.bfloat16)                                 # halve HBM bytes
    Lp = L + 2 * pad
    n_frames = (Lp - N_FFT) // HOP_LENGTH + 1

    # Gather-free framing: n_fft = 3*hop + 32, so frame t is the concatenation of
    # hop-rows t, t+1, t+2 and the first 32 samples of hop-row t+3.
    n_hops = max(n_frames + 3, -(-Lp // HOP_LENGTH))
    wp = jnp.pad(wp, ((0, 0), (0, 0), (0, n_hops * HOP_LENGTH - Lp)))
    hops = wp.reshape(B, 2, n_hops, HOP_LENGTH)                  # (B, 2, n_hops, 160)
    tail = N_FFT - 3 * HOP_LENGTH                                # 32
    frames = jnp.concatenate(
        [hops[:, :, 0:n_frames, :],
         hops[:, :, 1:1 + n_frames, :],
         hops[:, :, 2:2 + n_frames, :],
         hops[:, :, 3:3 + n_frames, :tail]], axis=-1)            # (B, 2, T, 512) bf16
    # TODO(synk): frames still materialize at ~3.2x the waveform size in HBM; the
    # remaining step is to DMA the padded waveform (memory_space=pl.ANY) and build
    # the frame tile in-kernel (hop=160 is sublane-unaligned; shifts land on XLU
    # slots which have slack since the kernel is MXU-bound).

    per_seg = -(-n_frames // N_SEG)                              # frames per segment
    n_t = -(-per_seg // MAX_TT)                                  # time tiles / segment
    tT = ((-(-per_seg // n_t) + 15) // 16) * 16                  # bf16 sublane aligned
    Tp = N_SEG * n_t * tT
    frames = jnp.pad(frames, ((0, 0), (0, 0), (0, Tp - n_frames), (0, 0)))
    return frames, n_frames, tT, n_t


# ---------------- Pallas kernel --------------------------------------------------
def mel_l1_kernel(fr_ref, dft_ref, fb_ref, out_ref):
    @pl.when(pl.program_id(2) == 0)
    def _init():
        out_ref[...] = jnp.zeros_like(out_ref)

    x = fr_ref[0]                                  # (2, tT, 512) bf16
    tT = x.shape[1]
    x = x.reshape(2 * tT, N_FFT)                   # clean rows [:tT], enhanced [tT:]

    # One MXU pass over the fused cos|sin DFT for both signals (f32 accumulate).
    spec = jnp.dot(x, dft_ref[...], preferred_element_type=jnp.float32)  # (2*tT, 512)

    # |mel_c - mel_e| = |(power_c - power_e) @ fb|  (filterbank linearity)
    sq = spec * spec                               # (2*tT, 512) f32
    d = sq[:tT] - sq[tT:]                          # (tT, 512) f32  clean - enhanced
    dpower = d[:, :FP] + d[:, FP:]                 # re^2 + im^2 difference, (tT, 256)
    # TODO(synk): keep dpower in f32 (bf16x3) for the fb matmul if <0.3%/bin
    # deviation from the f32 torch reference is required (~11% extra MXU FLOPs).
    dmel = jnp.dot(dpower.astype(jnp.bfloat16), fb_ref[...],
                   preferred_element_type=jnp.float32)                   # (tT, 256)

    out_ref[...] += jnp.sum(jnp.abs(dmel), axis=0, keepdims=True)[None, None]


def _pallas_mel_l1_sums(frames, dft, fb, tT, n_seg, n_t):
    B = frames.shape[0]
    return pl.pallas_call(
        mel_l1_kernel,
        out_shape=jax.ShapeDtypeStruct((B, n_seg, 1, MP), jnp.float32),
        grid=(B, n_seg, n_t),
        in_specs=[
            pl.BlockSpec((1, 2, tT, N_FFT),
                         lambda b, s, t: (b, 0, s * n_t + t, 0)),
            pl.BlockSpec((N_FFT, 2 * FP), lambda b, s, t: (0, 0),
                         pipeline_mode=pl.Buffered(1)),          # constant: 1 buffer
            pl.BlockSpec((FP, MP), lambda b, s, t: (0, 0),
                         pipeline_mode=pl.Buffered(1)),          # constant: 1 buffer
        ],
        out_specs=pl.BlockSpec((1, 1, 1, MP), lambda b, s, t: (b, s, 0, 0)),
        compiler_params=pltpu.CompilerParams(
            dimension_semantics=("parallel", "parallel", "arbitrary"),
            vmem_limit_bytes=32 * 1024 * 1024),
    )(frames, dft, fb)


# ---------------- public wrapper: MultiMelSTFTLoss.forward -----------------------
def multi_mel_stft_loss(clean, enhanced):
    """clean, enhanced: (B, L) float32 waveforms -> scalar loss."""
    B = clean.shape[0]
    frames, n_frames, tT, n_t = build_frames(clean, enhanced)
    dft = dft_matrix_bf16()
    fb = combined_filterbank_bf16()

    sums = _pallas_mel_l1_sums(frames, dft, fb, tT, N_SEG, n_t)  # (B, N_SEG, 1, MP)
    sums = jnp.sum(sums[:, :, 0, :], axis=(0, 1))                # (MP,)

    # per-filterbank L1 mean, averaged over the 3 banks (matches torch)
    loss = 0.0
    off = 0
    for n_mels in MEL_BANKS:
        loss = loss + jnp.sum(sums[off:off + n_mels]) / (B * n_mels * n_frames)
        off += n_mels
    return loss / len(MEL_BANKS)


# ---------------- pure-JAX f32 reference (sanity check) --------------------------
def _reference_loss(clean, enhanced):
    def frame_f32(x):
        B, L = x.shape
        pad = N_FFT // 2
        xp = jnp.pad(x, ((0, 0), (pad, pad)), mode="reflect")
        n_frames = (L + 2 * pad - N_FFT) // HOP_LENGTH + 1
        idx = (jnp.arange(n_frames)[:, None] * HOP_LENGTH
               + jnp.arange(N_FFT)[None, :])
        return xp[:, idx].astype(jnp.float32), n_frames

    fc, _ = frame_f32(clean)
    fe, _ = frame_f32(enhanced)
    win = padded_window()
    n = jnp.arange(N_FFT, dtype=jnp.float32)[:, None]
    f = jnp.arange(N_FREQS, dtype=jnp.float32)[None, :]
    ang = 2.0 * math.pi * n * f / N_FFT
    cos_m = win[:, None] * jnp.cos(ang)
    sin_m = win[:, None] * jnp.sin(ang)

    def mel(frames, fb):
        re = frames @ cos_m
        im = frames @ sin_m
        return (re * re + im * im) @ fb

    loss = 0.0
    for n_mels in MEL_BANKS:
        fb = mel_filterbank(n_mels)
        loss = loss + jnp.mean(jnp.abs(mel(fc, fb) - mel(fe, fb)))
    return loss / len(MEL_BANKS)


if __name__ == "__main__":
    key = jax.random.PRNGKey(0)
    k1, k2 = jax.random.split(key)
    B, L = 2, 1600                                   # 0.1 s of 16 kHz audio
    clean = jax.random.normal(k1, (B, L), dtype=jnp.float32)
    enhanced = clean + 0.1 * jax.random.normal(k2, (B, L), dtype=jnp.float32)

    loss = jax.jit(multi_mel_stft_loss)(clean, enhanced)
    loss = jax.block_until_ready(loss)

    ref = jax.block_until_ready(_reference_loss(clean, enhanced))
    # bf16 matmul operands (f32 accumulation) -> tolerance looser than pure f32.
    assert jnp.allclose(loss, ref, rtol=3e-2, atol=1e-3), (loss, ref)

    print("KERNEL_OK")
</pallas_src>

<mosaic_0001>
module attributes {stable_mosaic.version = 11 : i64} {
  func.func @mel_l1_kernel(%arg0: i32, %arg1: i32, %arg2: i32, %arg3: memref<1x2x16x512xbf16, #tpu.memory_space<vmem>>, %arg4: memref<512x512xbf16, #tpu.memory_space<vmem>>, %arg5: memref<256x256xbf16, #tpu.memory_space<vmem>>, %arg6: memref<1x1x1x256xf32, #tpu.memory_space<vmem>>) attributes {dimension_semantics = [#tpu.dimension_semantics<parallel>, #tpu.dimension_semantics<parallel>, #tpu.dimension_semantics<arbitrary>], iteration_bounds = array<i64: 2, 2, 1>, scalar_prefetch = 0 : i64, scratch_operands = 0 : i64, tpu.core_type = #tpu.core_type<tc>, window_params = [{transform_indices = @transform_0, window_bounds = array<i64: 1, 2, 16, 512>}, {pipeline_mode = #tpu.pipeline_mode<synchronous>, transform_indices = @transform_1, window_bounds = array<i64: 512, 512>}, {pipeline_mode = #tpu.pipeline_mode<synchronous>, transform_indices = @transform_2, window_bounds = array<i64: 256, 256>}, {transform_indices = @transform_3, window_bounds = array<i64: 1, 1, 1, 256>}]} {
    %c0_i32 = arith.constant 0 : i32
    %0 = arith.cmpi eq, %arg2, %c0_i32 : i32
    %1 = arith.extui %0 : i1 to i32
    %c0_i32_0 = arith.constant 0 : i32
    %2 = arith.cmpi ne, %1, %c0_i32_0 : i32
    scf.if %2 {
      %cst_18 = arith.constant 0.000000e+00 : f32
      %25 = vector.broadcast %cst_18 : f32 to vector<1x1x1x256xf32>
      %c0_19 = arith.constant 0 : index
      %c0_20 = arith.constant 0 : index
      %c0_21 = arith.constant 0 : index
      %c0_22 = arith.constant 0 : index
      %26 = vector.load %arg6[%c0_19, %c0_20, %c0_21, %c0_22] : memref<1x1x1x256xf32, #tpu.memory_space<vmem>>, vector<1x1x1x256xf32>
      tpu.vector_store %arg6[%c0_19, %c0_20, %c0_21, %c0_22], %25 {strides = array<i32>} : memref<1x1x1x256xf32, #tpu.memory_space<vmem>>, vector<1x1x1x256xf32>,
    } else {
    }
    %c0 = arith.constant 0 : index
    %c0_1 = arith.constant 0 : index
    %c0_2 = arith.constant 0 : index
    %c0_3 = arith.constant 0 : index
    %3 = vector.load %arg3[%c0, %c0_1, %c0_2, %c0_3] : memref<1x2x16x512xbf16, #tpu.memory_space<vmem>>, vector<1x2x16x512xbf16>
    %4 = vector.shape_cast %3 : vector<1x2x16x512xbf16> to vector<2x16x512xbf16>
    %5 = vector.shape_cast %4 : vector<2x16x512xbf16> to vector<32x512xbf16>
    %c0_4 = arith.constant 0 : index
    %c0_5 = arith.constant 0 : index
    %6 = vector.load %arg4[%c0_4, %c0_5] : memref<512x512xbf16, #tpu.memory_space<vmem>>, vector<512x512xbf16>
    %cst = arith.constant dense<0.000000e+00> : vector<32x512xf32>
    %7 = tpu.matmul %5, %6, %cst {dimension_numbers = #tpu.dot_dimension_numbers<[1], [0], [0], [1], [0, 0, 1, 1], [], []>} : vector<32x512xbf16>, vector<512x512xbf16>, vector<32x512xf32> -> vector<32x512xf32>
    %8 = arith.mulf %7, %7 : vector<32x512xf32>
    %9 = vector.extract_strided_slice %8 {offsets = [0, 0], sizes = [16, 512], strides = [1, 1]} : vector<32x512xf32> to vector<16x512xf32>
    %10 = vector.extract_strided_slice %8 {offsets = [16, 0], sizes = [16, 512], strides = [1, 1]} : vector<32x512xf32> to vector<16x512xf32>
    %11 = arith.subf %9, %10 : vector<16x512xf32>
    %12 = vector.extract_strided_slice %11 {offsets = [0, 0], sizes = [16, 256], strides = [1, 1]} : vector<16x512xf32> to vector<16x256xf32>
    %13 = vector.extract_strided_slice %11 {offsets = [0, 256], sizes = [16, 256], strides = [1, 1]} : vector<16x512xf32> to vector<16x256xf32>
    %14 = arith.addf %12, %13 : vector<16x256xf32>
    %15 = arith.truncf %14 : vector<16x256xf32> to vector<16x256xbf16>
    %c0_6 = arith.constant 0 : index
    %c0_7 = arith.constant 0 : index
    %16 = vector.load %arg5[%c0_6, %c0_7] : memref<256x256xbf16, #tpu.memory_space<vmem>>, vector<256x256xbf16>
    %cst_8 = arith.constant dense<0.000000e+00> : vector<16x256xf32>
    %17 = tpu.matmul %15, %16, %cst_8 {dimension_numbers = #tpu.dot_dimension_numbers<[1], [0], [0], [1], [0, 0, 1, 1], [], []>} : vector<16x256xbf16>, vector<256x256xbf16>, vector<16x256xf32> -> vector<16x256xf32>
    %c0_9 = arith.constant 0 : index
    %c0_10 = arith.constant 0 : index
    %c0_11 = arith.constant 0 : index
    %c0_12 = arith.constant 0 : index
    %18 = vector.load %arg6[%c0_9, %c0_10, %c0_11, %c0_12] : memref<1x1x1x256xf32, #tpu.memory_space<vmem>>, vector<1x1x1x256xf32>
    %19 = math.absf %17 : vector<16x256xf32>
    %cst_13 = arith.constant dense<0.000000e+00> : vector<256xf32>
    %20 = vector.multi_reduction <add>, %19, %cst_13 [0] : vector<16x256xf32> to vector<256xf32>
    %21 = vector.shape_cast %20 : vector<256xf32> to vector<1x256xf32>
    %22 = vector.shape_cast %21 : vector<1x256xf32> to vector<1x1x1x256xf32>
    %23 = arith.addf %18, %22 : vector<1x1x1x256xf32>
    %c0_14 = arith.constant 0 : index
    %c0_15 = arith.constant 0 : index
    %c0_16 = arith.constant 0 : index
    %c0_17 = arith.constant 0 : index
    %24 = vector.load %arg6[%c0_14, %c0_15, %c0_16, %c0_17] : memref<1x1x1x256xf32, #tpu.memory_space<vmem>>, vector<1x1x1x256xf32>
    tpu.vector_store %arg6[%c0_14, %c0_15, %c0_16, %c0_17], %23 {strides = array<i32>} : memref<1x1x1x256xf32, #tpu.memory_space<vmem>>, vector<1x1x1x256xf32>,
    return
  }
  func.func @transform_0(%arg0: i32, %arg1: i32, %arg2: i32) -> (i32, i32, i32, i32) {
    %c1_i32 = arith.constant 1 : i32
    %0 = arith.muli %arg1, %c1_i32 : i32
    %1 = arith.addi %0, %arg2 : i32
    %c0_i32 = arith.constant 0 : i32
    %c0_i32_0 = arith.constant 0 : i32
    %c0_i32_1 = arith.constant 0 : i32
    return %arg0, %c0_i32, %1, %c0_i32_0 : i32, i32, i32, i32
  }
  func.func @transform_1(%arg0: i32, %arg1: i32, %arg2: i32) -> (i32, i32) {
    %c0_i32 = arith.constant 0 : i32
    %c0_i32_0 = arith.constant 0 : i32
    %c0_i32_1 = arith.constant 0 : i32
    return %c0_i32, %c0_i32_0 : i32, i32
  }
  func.func @transform_2(%arg0: i32, %arg1: i32, %arg2: i32) -> (i32, i32) {
    %c0_i32 = arith.constant 0 : i32
    %c0_i32_0 = arith.constant 0 : i32
    %c0_i32_1 = arith.constant 0 : i32
    return %c0_i32, %c0_i32_0 : i32, i32
  }
  func.func @transform_3(%arg0: i32, %arg1: i32, %arg2: i32) -> (i32, i32, i32, i32) {
    %c0_i32 = arith.constant 0 : i32
    %c0_i32_0 = arith.constant 0 : i32
    %c0_i32_1 = arith.constant 0 : i32
    return %arg0, %arg1, %c0_i32, %c0_i32_0 : i32, i32, i32, i32
  }
}

</mosaic_0001>

<bundles_post_ra>
// kernel: multi_mel_stft_loss.1
= control target key start
LH: loop header
LB: loop body
LE: loop exit
PB: predicated region body
PF: predicated region fallthrough
CT: control target
= control target key end

     0   :  { %s2763_s12 = smov 0   ;;  %s2765_s13 = smov 0   ;;  %s3929_s0 = inlined_call_operand.vmem [shape: bf16[2,2,32,512], index: 0, kind: input, shape index: {}]   ;;  %s3930_s1 = inlined_call_operand.vmem [shape: bf16[512,512], index: 1, kind: input, shape index: {}]   ;;  %s3931_s2 = inlined_call_operand.vmem [shape: bf16[256,256], index: 2, kind: input, shape index: {}]   ;;  %s3932_s3 = inlined_call_operand.vmem [shape: f32[2,2,1,256], index: 3, kind: output, shape index: {}]  }
   0x1   :  { %s2767_s14 = smov 0   ;;  %s2769_s15 = smov 0  }
   0x2   :  { %s2771_s16 = smov 0   ;;  %s2773_s17 = smov 0  }
   0x3   :  { %s2775_s18 = smov 0  }
   0x4 LB: > { %s28_s19 = sadd.s32 1, %s2732_s16  ;;  %s32_s20 = sadd.s32 1, %s2736_s17  ;;  %s2740_s18 = sphi %s2775_s18, %s13_s18   ;;  %s2736_s17 = sphi %s2773_s17, %s3940_s17   ;;  %s2732_s16 = sphi %s2771_s16, %s3939_s16   ;;  %s2728_s15 = sphi %s2769_s15, %s3938_s15   ;;  %s2724_s14 = sphi %s2767_s14, %s3937_s14   ;;  %s2720_s13 = sphi %s2765_s13, %s3936_s13   ;;  %s2716_s12 = sphi %s2763_s12, %s3935_s12  }
   0x5   : > { %p30_p0 = scmp.ge.s32.totalorder %s28_s19, 2  ;;  %p50_p1 = scmp.ne.s32.totalorder %s2720_s13, %s2716_s12 }
   0x6   : > { %p51_p2 = scmp.eq.s32.totalorder %s2740_s18, 0  ;;  %s43_s24 = sadd.s32 1, %s2720_s13 }
   0x7   : > { %s3942_s19 = smov (%p30_p0, %s28_s19), 0  ;;  %s3944_s20 = smov (!%p30_p0, %s32_s20), %s2736_s17 }
   0x8   : > { %p52_p3 = por %p51_p2, %p50_p1  ;;  %p34_p4 = scmp.ge.s32.totalorder %s3944_s20, 2 }
   0x9   : > { %s39_s21 = ssub.s32 %s2732_s16, %s3942_s19  ;;  %p1776_p6 = scmp.ge.s32.totalorder %s2740_s18, 4 }
   0xa   : > { %s3946_s20 = smov (%p34_p4, %s3944_s20), 0 }
   0xb   : > { %s38_s22 = ssub.s32 %s2736_s17, %s3946_s20  ;;  %152 = sbr.rel (%p1776_p6) target bundleno = 31 (0x1f), region = 24 }
   0xc   : > { %s40_s23 = sor.u32 %s39_s21, %s38_s22 }
   0xd   : > { %p41_p5 = scmp.eq.s32.totalorder %s40_s23, 0 }
   0xf   : > { %s2814_s25 = scalar_select %p41_p5, %s2720_s13, %s43_s24  }
  0x10   : > { %155 = sbr.rel (!%p52_p3) target bundleno = 31 (0x1f), region = 28  ;;  %s157_s26 = sand.u32 (%p52_p3), 1, %s2720_s13  }
  0x11   : > { %s2460_s27 = sshll.u32 (%p52_p3), %s2732_s16, 3  ;;  %s1777_s28 = sshll.u32 (%p52_p3), %s157_s26, 6 }
  0x12   : > { %s1780_s29 = sshll.u32 (%p52_p3), %s2736_s17, 5  ;;  %s159_s8 = scalar_lea.vmem (%p52_p3), [#allocation2], %s1777_s28 }
  0x13   : > { %s164_s30 = sadd.s32 (%p52_p3), %s2460_s27, %s1780_s29 }
  0x14   : > { %s1781_s4 = sshll.u32 (%p52_p3), %s164_s30, 2 }
  0x15   : > { %s166_s7 = scalar_lea.vmem %s3929_s0, %s1781_s4 }
  0x16   : > { %v179_v0 = vld [vmem:[%s166_s7] sm:$0xff]  ;;  %v181_v1 = vld [vmem:[%s166_s7 + $0x8] sm:$0xff]  ;;  %v183_v2 = vld [vmem:[%s166_s7 + $0x10] sm:$0xff] }
  0x17   : > { %180 = vst [vmem:[%s159_s8] sm:$0xff] %v179_v0  ;;  %v185_v3 = vld [vmem:[%s166_s7 + $0x18] sm:$0xff]  ;;  %v187_v4 = vld [vmem:[%s166_s7 + $0x40] sm:$0xff]  ;;  %v189_v5 = vld [vmem:[%s166_s7 + $0x48] sm:$0xff] }
  0x18   : > { %182 = vst [vmem:[%s159_s8 + $0x8] sm:$0xff] %v181_v1  ;;  %v191_v6 = vld [vmem:[%s166_s7 + $0x50] sm:$0xff]  ;;  %v193_v7 = vld [vmem:[%s166_s7 + $0x58] sm:$0xff] }
  0x19   : > { %184 = vst [vmem:[%s159_s8 + $0x10] sm:$0xff] %v183_v2 }
  0x1a   : > { %186 = vst [vmem:[%s159_s8 + $0x18] sm:$0xff] %v185_v3 }
  0x1b   : > { %188 = vst [vmem:[%s159_s8 + $0x20] sm:$0xff] %v187_v4 }
  0x1c   : > { %190 = vst [vmem:[%s159_s8 + $0x28] sm:$0xff] %v189_v5 }
  0x1d   : > { %192 = vst [vmem:[%s159_s8 + $0x30] sm:$0xff] %v191_v6 }
  0x1e   : > { %194 = vst [vmem:[%s159_s8 + $0x38] sm:$0xff] %v193_v7 }
  0x1f PF: > { %p1782_p7 = scmp.ge.s32.totalorder %s2740_s18, 1  ;;  %p199_p8 = scmp.lt.s32.totalorder %s2740_s18, 5 }
  0x21   : > { %p200_p9 = pnand %p1782_p7, %p199_p8 }
  0x22   : > { %s206_s27 = sand.u32 (!%p200_p9), 1, %s2716_s12   ;;  %p234_p10 = scmp.lt.s32.totalorder (!%p200_p9), %s2728_s15, 1 }
  0x23   : > { %203 = sbr.rel (%p200_p9) target bundleno = 505 (0x1f9), region = 51  ;;  %s1783_s5 = sshll.u32 (!%p200_p9), %s206_s27, 6 }
  0x24   : > { %s3021_s4 = scalar_lea.vmem (!%p200_p9), [#allocation2], %s1783_s5  ;;  %p236_p11 = scmp.lt.s32.totalorder (!%p200_p9), %s2724_s14, 1 }
  0x28   : > { %v1932_v8 = vld [vmem:[%s3930_s1 + $0xe0] sm:$0xf]  ;;  %v2499_v9 = vld [vmem:[%s3930_s1 + $0xec] sm:$0xf0]  ;;  %s3948_s15 = smov (!%p234_p10, %s2728_s15), 1  ;;  %s3950_s14 = smov (!%p236_p11, %s2724_s14), 1 }
  0x29   : > { %v2060_v10 = vld [vmem:[%s3930_s1 + $0x1e0] sm:$0xf]  ;;  %v1933_v11 = vor.u32 %v2499_v9, %v1932_v8  ;;  %v2531_v12 = vld [vmem:[%s3930_s1 + $0x1ec] sm:$0xf0]  ;;  %s1784_s22 = sshll.u32 %s3950_s14, 1  ;;  %s1785_s23 = sshll.u32 %s3948_s15, 2 }
  0x2a   : > { %v2188_v13 = vld [vmem:[%s3930_s1 + $0x2e0] sm:$0xf]  ;;  %v2563_v14 = vld [vmem:[%s3930_s1 + $0x2ec] sm:$0xf0]  ;;  %v2061_v15 = vor.u32 %v2531_v12, %v2060_v10  ;;  %s240_s24 = sadd.s32 %s1785_s23, %s1784_s22  ;;  %vm1671_vm1 = vcmask 1040384  }
  0x2b   : > { %v2189_v16 = vor.u32 %v2563_v14, %v2188_v13  ;;  %v2316_v17 = vld [vmem:[%s3930_s1 + $0x3e0] sm:$0xf]  ;;  %v2595_v18 = vld [vmem:[%s3930_s1 + $0x3ec] sm:$0xf0]  ;;  %1067 = vmatpush.bf16.msra.mxu0 %v1933_v11  ;;  %s3895_s28 = scalar_lea.vmem %s3932_s3, %s240_s24 }
  0x2c   : > { %v1916_v19 = vld [vmem:[%s3930_s1 + $0xc0] sm:$0xf]  ;;  %v2317_v20 = vor.u32 %v2595_v18, %v2316_v17  ;;  %v2495_v21 = vld [vmem:[%s3930_s1 + $0xcc] sm:$0xf0]  ;;  %1086 = vmatpush.bf16.msra.mxu1 %v2061_v15 }
  0x2d   : > { %v2044_v22 = vld [vmem:[%s3930_s1 + $0x1c0] sm:$0xf]  ;;  %v2527_v23 = vld [vmem:[%s3930_s1 + $0x1cc] sm:$0xf0]  ;;  %1105 = vmatpush.bf16.msra.mxu2 %v2189_v16  ;;  %v1917_v24 = vor.u32 %v2495_v21, %v1916_v19 }
  0x2e   : > { %v2045_v25 = vor.u32 %v2527_v23, %v2044_v22  ;;  %v2172_v26 = vld [vmem:[%s3930_s1 + $0x2c0] sm:$0xf]  ;;  %v2559_v27 = vld [vmem:[%s3930_s1 + $0x2cc] sm:$0xf0]  ;;  %1124 = vmatpush.bf16.msra.mxu3 %v2317_v20 }
  0x2f   : > { %v2300_v28 = vld [vmem:[%s3930_s1 + $0x3c0] sm:$0xf]  ;;  %v2173_v29 = vor.u32 %v2559_v27, %v2172_v26  ;;  %v2591_v30 = vld [vmem:[%s3930_s1 + $0x3cc] sm:$0xf0]  ;;  %1068 = vmatpush.bf16.msra.mxu0 %v1917_v24 }
  0x30   : > { %v1900_v31 = vld [vmem:[%s3930_s1 + $0xa0] sm:$0xf]  ;;  %v2491_v32 = vld [vmem:[%s3930_s1 + $0xac] sm:$0xf0]  ;;  %v2301_v33 = vor.u32 %v2591_v30, %v2300_v28  ;;  %1087 = vmatpush.bf16.msra.mxu1 %v2045_v25 }
  0x31   : > { %v2028_v34 = vld [vmem:[%s3930_s1 + $0x1a0] sm:$0xf]  ;;  %v2523_v35 = vld [vmem:[%s3930_s1 + $0x1ac] sm:$0xf0]  ;;  %v1901_v37 = vor.u32 %v2491_v32, %v1900_v31  ;;  %1106 = vmatpush.bf16.msra.mxu2 %v2173_v29 }
  0x32   : > { %v2156_v36 = vld [vmem:[%s3930_s1 + $0x2a0] sm:$0xf]  ;;  %v2555_v38 = vld [vmem:[%s3930_s1 + $0x2ac] sm:$0xf0]  ;;  %v2029_v41 = vor.u32 %v2523_v35, %v2028_v34  ;;  %1125 = vmatpush.bf16.msra.mxu3 %v2301_v33 }
  0x33   : > { %v2284_v39 = vld [vmem:[%s3930_s1 + $0x3a0] sm:$0xf]  ;;  %v2587_v40 = vld [vmem:[%s3930_s1 + $0x3ac] sm:$0xf0]  ;;  %v2157_v42 = vor.u32 %v2555_v38, %v2156_v36  ;;  %1069 = vmatpush.bf16.msra.mxu0 %v1901_v37  ;;  %v2561_v36 = vld [vmem:[%s3930_s1 + $0x2e4] sm:$0xf] }
  0x34   : > { %v1884_v43 = vld [vmem:[%s3930_s1 + $0x80] sm:$0xf]  ;;  %v2487_v44 = vld [vmem:[%s3930_s1 + $0x8c] sm:$0xf0]  ;;  %v2285_v46 = vor.u32 %v2587_v40, %v2284_v39  ;;  %1088 = vmatpush.bf16.msra.mxu1 %v2029_v41  ;;  %v2190_v38 = vld [vmem:[%s3930_s1 + $0x2f0] sm:$0xf0] }
  0x35   : > { %v2012_v45 = vld [vmem:[%s3930_s1 + $0x180] sm:$0xf]  ;;  %v2519_v47 = vld [vmem:[%s3930_s1 + $0x18c] sm:$0xf0]  ;;  %v1885_v52 = vor.u32 %v2487_v44, %v1884_v43  ;;  %1107 = vmatpush.bf16.msra.mxu2 %v2157_v42  ;;  %v2529_v39 = vld [vmem:[%s3930_s1 + $0x1e4] sm:$0xf] }
  0x36   : > { %v2140_v48 = vld [vmem:[%s3930_s1 + $0x280] sm:$0xf]  ;;  %v2551_v49 = vld [vmem:[%s3930_s1 + $0x28c] sm:$0xf0]  ;;  %v2013_v53 = vor.u32 %v2519_v47, %v2012_v45  ;;  %1126 = vmatpush.bf16.msra.mxu3 %v2285_v46  ;;  %v2461_v42 = vld [vmem:[%s3021_s4 + $0x4] sm:$0xf] }
  0x37   : > { %v2268_v50 = vld [vmem:[%s3930_s1 + $0x380] sm:$0xf]  ;;  %v2583_v51 = vld [vmem:[%s3930_s1 + $0x38c] sm:$0xf0]  ;;  %v2141_v54 = vor.u32 %v2551_v49, %v2140_v48  ;;  %1070 = vmatpush.bf16.msra.mxu0 %v1885_v52  ;;  %v2497_v43 = vld [vmem:[%s3930_s1 + $0xe4] sm:$0xf] }
  0x38   : > { %v1868_v55 = vld [vmem:[%s3930_s1 + $0x60] sm:$0xf]  ;;  %v2483_v56 = vld [vmem:[%s3930_s1 + $0x6c] sm:$0xf0]  ;;  %v2269_v58 = vor.u32 %v2583_v51, %v2268_v50  ;;  %1089 = vmatpush.bf16.msra.mxu1 %v2013_v53  ;;  %v1934_v44 = vld [vmem:[%s3930_s1 + $0xf0] sm:$0xf0] }
  0x39   : > { %v1996_v57 = vld [vmem:[%s3930_s1 + $0x160] sm:$0xf]  ;;  %v2515_v59 = vld [vmem:[%s3930_s1 + $0x16c] sm:$0xf0]  ;;  %v1869_v0 = vor.u32 %v2483_v56, %v1868_v55  ;;  %1108 = vmatpush.bf16.msra.mxu2 %v2141_v54  ;;  %v2062_v45 = vld [vmem:[%s3930_s1 + $0x1f0] sm:$0xf0]  ;;  %v2193_v54 = vor.u32 %v2561_v36, %v2190_v38 }
  0x3a   : > { %v2124_v60 = vld [vmem:[%s3930_s1 + $0x260] sm:$0xf]  ;;  %v2547_v61 = vld [vmem:[%s3930_s1 + $0x26c] sm:$0xf0]  ;;  %v1997_v1 = vor.u32 %v2515_v59, %v1996_v57  ;;  %1127 = vmatpush.bf16.msra.mxu3 %v2269_v58  ;;  %v1790_v48 = vld [vmem:[%s3021_s4 + $0x10] sm:$0xf0]  ;;  %v2065_v57 = vor.u32 %v2529_v39, %v2062_v45 }
  0x3b   : > { %v2252_v62 = vld [vmem:[%s3930_s1 + $0x360] sm:$0xf]  ;;  %v2579_v63 = vld [vmem:[%s3930_s1 + $0x36c] sm:$0xf0]  ;;  %v2125_v2 = vor.u32 %v2547_v61, %v2124_v60  ;;  %1071 = vmatpush.bf16.msra.mxu0 %v1869_v0  ;;  %v1796_v49 = vld [vmem:[%s3021_s4 + $0x8] sm:$0xf]  ;;  %v3060_v61 = vor.u32 %v2461_v42, %v1790_v48 }
  0x3c   : > { %v1852_v3 = vld [vmem:[%s3930_s1 + $0x40] sm:$0xf]  ;;  %v2479_v4 = vld [vmem:[%s3930_s1 + $0x4c] sm:$0xf0]  ;;  %v2253_v6 = vor.u32 %v2579_v63, %v2252_v62  ;;  %1090 = vmatpush.bf16.msra.mxu1 %v1997_v1  ;;  %v2464_v50 = vld [vmem:[%s3021_s4 + $0x14] sm:$0xf0] }
  0x3d   : > { %v1980_v5 = vld [vmem:[%s3930_s1 + $0x140] sm:$0xf]  ;;  %v2511_v7 = vld [vmem:[%s3930_s1 + $0x14c] sm:$0xf0]  ;;  %v1853_v12 = vor.u32 %v2479_v4, %v1852_v3  ;;  %1109 = vmatpush.bf16.msra.mxu2 %v2125_v2  ;;  %v2462_v52 = vld [vmem:[%s3021_s4 + $0xc] sm:$0xf]  ;;  %v3062_v62 = vor.u32 %v2464_v50, %v1796_v49  ;;  %v1937_v2 = vor.u32 %v2497_v43, %v1934_v44 }
  0x3e   : > { %v2108_v8 = vld [vmem:[%s3930_s1 + $0x240] sm:$0xf]  ;;  %v2543_v9 = vld [vmem:[%s3930_s1 + $0x24c] sm:$0xf0]  ;;  %v1981_v15 = vor.u32 %v2511_v7, %v1980_v5  ;;  %1128 = vmatpush.bf16.msra.mxu3 %v2253_v6  ;;  %v1798_v53 = vld [vmem:[%s3021_s4 + $0x18] sm:$0xf0] }
  0x3f   : > { %v2236_v10 = vld [vmem:[%s3930_s1 + $0x340] sm:$0xf]  ;;  %v2575_v11 = vld [vmem:[%s3930_s1 + $0x34c] sm:$0xf0]  ;;  %v2109_v16 = vor.u32 %v2543_v9, %v2108_v8  ;;  %1072 = vmatpush.bf16.msra.mxu0 %v1853_v12  ;;  %v2593_v55 = vld [vmem:[%s3930_s1 + $0x3e4] sm:$0xf]  ;;  %v3070_v1 = vor.u32 %v2462_v52, %v1798_v53 }
  0x40   : > { %v1836_v13 = vld [vmem:[%s3930_s1 + $0x20] sm:$0xf]  ;;  %v2475_v14 = vld [vmem:[%s3930_s1 + $0x2c] sm:$0xf0]  ;;  %v2237_v20 = vor.u32 %v2575_v11, %v2236_v10  ;;  %1091 = vmatpush.bf16.msra.mxu1 %v1981_v15  ;;  %v2318_v58 = vld [vmem:[%s3930_s1 + $0x3f0] sm:$0xf0] }
  0x41   : > { %v1964_v17 = vld [vmem:[%s3930_s1 + $0x120] sm:$0xf]  ;;  %v2507_v18 = vld [vmem:[%s3930_s1 + $0x12c] sm:$0xf0]  ;;  %v1837_v25 = vor.u32 %v2475_v14, %v1836_v13  ;;  %1110 = vmatpush.bf16.msra.mxu2 %v2109_v16  ;;  %v2557_v59 = vld [vmem:[%s3930_s1 + $0x2c4] sm:$0xf]  ;;  %v2321_v3 = vor.u32 %v2593_v55, %v2318_v58 }
  0x42   : > { %v2092_v19 = vld [vmem:[%s3930_s1 + $0x220] sm:$0xf]  ;;  %v2539_v21 = vld [vmem:[%s3930_s1 + $0x22c] sm:$0xf0]  ;;  %v1965_v28 = vor.u32 %v2507_v18, %v1964_v17  ;;  %1129 = vmatpush.bf16.msra.mxu3 %v2237_v20  ;;  %v2174_v60 = vld [vmem:[%s3930_s1 + $0x2d0] sm:$0xf0] }
  0x43   : > { %v2220_v22 = vld [vmem:[%s3930_s1 + $0x320] sm:$0xf]  ;;  %v2571_v23 = vld [vmem:[%s3930_s1 + $0x32c] sm:$0xf0]  ;;  %v2093_v29 = vor.u32 %v2539_v21, %v2092_v19  ;;  %1073 = vmatpush.bf16.msra.mxu0 %v1837_v25  ;;  %v2525_v63 = vld [vmem:[%s3930_s1 + $0x1c4] sm:$0xf]  ;;  %v2177_v4 = vor.u32 %v2557_v59, %v2174_v60 }
  0x44   : > { %v1820_v24 = vld [vmem:[%s3930_s1] sm:$0xf]  ;;  %v2471_v26 = vld [vmem:[%s3930_s1 + $0xc] sm:$0xf0]  ;;  %v2221_v33 = vor.u32 %v2571_v23, %v2220_v22  ;;  %1092 = vmatpush.bf16.msra.mxu1 %v1965_v28  ;;  %v2046_v0 = vld [vmem:[%s3930_s1 + $0x1d0] sm:$0xf0] }
  0x45   : > { %v1948_v27 = vld [vmem:[%s3930_s1 + $0x100] sm:$0xf]  ;;  %v2503_v30 = vld [vmem:[%s3930_s1 + $0x10c] sm:$0xf0]  ;;  %v1821_v40 = vor.u32 %v2471_v26, %v1820_v24  ;;  %1111 = vmatpush.bf16.msra.mxu2 %v2093_v29  ;;  %v2493_v5 = vld [vmem:[%s3930_s1 + $0xc4] sm:$0xf]  ;;  %v2049_v8 = vor.u32 %v2525_v63, %v2046_v0 }
  0x46   : > { %v2076_v31 = vld [vmem:[%s3930_s1 + $0x200] sm:$0xf]  ;;  %v2535_v32 = vld [vmem:[%s3930_s1 + $0x20c] sm:$0xf0]  ;;  %v1949_v46 = vor.u32 %v2503_v30, %v1948_v27  ;;  %1130 = vmatpush.bf16.msra.mxu3 %v2221_v33  ;;  %v1918_v6 = vld [vmem:[%s3930_s1 + $0xd0] sm:$0xf0] }
  0x47   : > { %v2204_v34 = vld [vmem:[%s3930_s1 + $0x300] sm:$0xf]  ;;  %v2567_v35 = vld [vmem:[%s3930_s1 + $0x30c] sm:$0xf0]  ;;  %v2077_v47 = vor.u32 %v2535_v32, %v2076_v31  ;;  %1074 = vmatpush.bf16.msra.mxu0 %v1821_v40  ;;  %v2589_v7 = vld [vmem:[%s3930_s1 + $0x3c4] sm:$0xf]  ;;  %v1921_v14 = vor.u32 %v2493_v5, %v1918_v6 }
  0x48   : > { %v1788_v37 = vld [vmem:[%s3021_s4] sm:$0xf]  ;;  %v2463_v41 = vld [vmem:[%s3021_s4 + $0xc] sm:$0xf0]  ;;  %v2205_v51 = vor.u32 %v2567_v35, %v2204_v34  ;;  %1093 = vmatpush.bf16.msra.mxu1 %v1949_v46  ;;  %v2302_v9 = vld [vmem:[%s3930_s1 + $0x3d0] sm:$0xf0] }
  0x49   : > { %v3049_v56 = vor.u32 %v2463_v41, %v1788_v37  ;;  %1112 = vmatpush.bf16.msra.mxu2 %v2077_v47  ;;  %v2553_v10 = vld [vmem:[%s3930_s1 + $0x2a4] sm:$0xf]  ;;  %v2158_v11 = vld [vmem:[%s3930_s1 + $0x2b0] sm:$0xf0]  ;;  %v2305_v15 = vor.u32 %v2589_v7, %v2302_v9  ;;  %v1804_v33 = vld [vmem:[%s3021_s4 + $0x20] sm:$0xf] }
  0x4a   : > { %1131 = vmatpush.bf16.msra.mxu3 %v2205_v51  ;;  %v2521_v12 = vld [vmem:[%s3930_s1 + $0x1a4] sm:$0xf]  ;;  %v2030_v13 = vld [vmem:[%s3930_s1 + $0x1b0] sm:$0xf0]  ;;  %v2161_v16 = vor.u32 %v2553_v10, %v2158_v11  ;;  %v2467_v34 = vld [vmem:[%s3021_s4 + $0x2c] sm:$0xf0] }
  0x4b   : > { %1075 = vmatmul.bf16.vlgmr.msra.gmra.mxu0 %v3049_v56  ;;  %1094 = vmatmul.bf16.vlgmr.msra.gmra.mxu1 %v3060_v61  ;;  %v2489_v17 = vld [vmem:[%s3930_s1 + $0xa4] sm:$0xf]  ;;  %v1902_v18 = vld [vmem:[%s3930_s1 + $0xb0] sm:$0xf0]  ;;  %v2033_v20 = vor.u32 %v2521_v12, %v2030_v13  ;;  %v1812_v40 = vld [vmem:[%s3021_s4 + $0x28] sm:$0xf]  ;;  %v3165_v52 = vor.u32 %v2467_v34, %v1804_v33 }
  0x4c   : > { %1162 = vmatpush.bf16.msrb.mxu1 %v2065_v57  ;;  %1113 = vmatmul.bf16.vlgmr.msra.gmra.mxu2 %v3062_v62  ;;  %v2585_v19 = vld [vmem:[%s3930_s1 + $0x3a4] sm:$0xf]  ;;  %v2286_v21 = vld [vmem:[%s3930_s1 + $0x3b0] sm:$0xf0]  ;;  %v1905_v26 = vor.u32 %v2489_v17, %v1902_v18  ;;  %v2468_v44 = vld [vmem:[%s3021_s4 + $0x34] sm:$0xf0] }
  0x4d   : > { %1181 = vmatpush.bf16.msrb.mxu2 %v2193_v54  ;;  %1132 = vmatmul.bf16.vlgmr.msra.gmra.mxu3 %v3070_v1  ;;  %v2549_v22 = vld [vmem:[%s3930_s1 + $0x284] sm:$0xf]  ;;  %v2142_v23 = vld [vmem:[%s3930_s1 + $0x290] sm:$0xf0]  ;;  %v2289_v30 = vor.u32 %v2585_v19, %v2286_v21  ;;  %v2466_v45 = vld [vmem:[%s3021_s4 + $0x2c] sm:$0xf]  ;;  %v3178_v59 = vor.u32 %v2468_v44, %v1812_v40 }
  0x4e   : > { %1143 = vmatpush.bf16.msrb.mxu0 %v1937_v2  ;;  %1200 = vmatpush.bf16.msrb.mxu3 %v2321_v3  ;;  %v2517_v24 = vld [vmem:[%s3930_s1 + $0x184] sm:$0xf]  ;;  %v2014_v25 = vld [vmem:[%s3930_s1 + $0x190] sm:$0xf0]  ;;  %v2145_v31 = vor.u32 %v2549_v22, %v2142_v23  ;;  %v1814_v46 = vld [vmem:[%s3021_s4 + $0x38] sm:$0xf0] }
  0x4f   : > { %v2485_v27 = vld [vmem:[%s3930_s1 + $0x84] sm:$0xf]  ;;  %v1886_v28 = vld [vmem:[%s3930_s1 + $0x90] sm:$0xf0]  ;;  %v2017_v35 = vor.u32 %v2517_v24, %v2014_v25  ;;  %v3186_v0 = vor.u32 %v2466_v45, %v1814_v46  ;;  %v2500_v40 = vld [vmem:[%s3930_s1 + $0xf4] sm:$0xf0] }
  0x50   : > { %1163 = vmatpush.bf16.msrb.mxu1 %v2049_v8  ;;  %v2581_v29 = vld [vmem:[%s3930_s1 + $0x384] sm:$0xf]  ;;  %v2270_v32 = vld [vmem:[%s3930_s1 + $0x390] sm:$0xf0]  ;;  %v1889_v43 = vor.u32 %v2485_v27, %v1886_v28  ;;  %v2564_v27 = vld [vmem:[%s3930_s1 + $0x2f4] sm:$0xf0] }
  0x51   : > { %1182 = vmatpush.bf16.msrb.mxu2 %v2177_v4  ;;  %v2465_v36 = vld [vmem:[%s3021_s4 + $0x24] sm:$0xf]  ;;  %v1806_v37 = vld [vmem:[%s3021_s4 + $0x30] sm:$0xf0]  ;;  %v2273_v47 = vor.u32 %v2581_v29, %v2270_v32  ;;  %v2180_v44 = vld [vmem:[%s3930_s1 + $0x2c8] sm:$0xf] }
  0x52   : > { %1144 = vmatpush.bf16.msrb.mxu0 %v1921_v14  ;;  %1201 = vmatpush.bf16.msrb.mxu3 %v2305_v15  ;;  %v2545_v38 = vld [vmem:[%s3930_s1 + $0x264] sm:$0xf]  ;;  %v2126_v39 = vld [vmem:[%s3930_s1 + $0x270] sm:$0xf0]  ;;  %v3176_v58 = vor.u32 %v2465_v36, %v1806_v37  ;;  %v2560_v45 = vld [vmem:[%s3930_s1 + $0x2d4] sm:$0xf0] }
  0x53   : > { %v2513_v41 = vld [vmem:[%s3930_s1 + $0x164] sm:$0xf]  ;;  %v1998_v42 = vld [vmem:[%s3930_s1 + $0x170] sm:$0xf0]  ;;  %v2129_v48 = vor.u32 %v2545_v38, %v2126_v39  ;;  %v1940_v39 = vld [vmem:[%s3930_s1 + $0xe8] sm:$0xf] }
  0x54   : > { %1164 = vmatpush.bf16.msrb.mxu1 %v2033_v20  ;;  %v2481_v49 = vld [vmem:[%s3930_s1 + $0x64] sm:$0xf]  ;;  %v1870_v50 = vld [vmem:[%s3930_s1 + $0x70] sm:$0xf0]  ;;  %v2001_v53 = vor.u32 %v2513_v41, %v1998_v42  ;;  %v2324_v41 = vld [vmem:[%s3930_s1 + $0x3e8] sm:$0xf] }
  0x55   : > { %1183 = vmatpush.bf16.msrb.mxu2 %v2161_v16  ;;  %v2577_v51 = vld [vmem:[%s3930_s1 + $0x364] sm:$0xf]  ;;  %v2254_v54 = vld [vmem:[%s3930_s1 + $0x370] sm:$0xf0]  ;;  %v1873_v2 = vor.u32 %v2481_v49, %v1870_v50  ;;  %v1924_v49 = vld [vmem:[%s3930_s1 + $0xc8] sm:$0xf] }
  0x56   : > { %1145 = vmatpush.bf16.msrb.mxu0 %v1905_v26  ;;  %1202 = vmatpush.bf16.msrb.mxu3 %v2289_v30  ;;  %v2541_v55 = vld [vmem:[%s3930_s1 + $0x244] sm:$0xf]  ;;  %v2110_v57 = vld [vmem:[%s3930_s1 + $0x250] sm:$0xf0]  ;;  %v2257_v3 = vor.u32 %v2577_v51, %v2254_v54  ;;  %v2196_v26 = vld [vmem:[%s3930_s1 + $0x2e8] sm:$0xf] }
  0x57   : > { %v2509_v60 = vld [vmem:[%s3930_s1 + $0x144] sm:$0xf]  ;;  %v1982_v63 = vld [vmem:[%s3930_s1 + $0x150] sm:$0xf0]  ;;  %v2113_v4 = vor.u32 %v2541_v55, %v2110_v57  ;;  %v2068_v30 = vld [vmem:[%s3930_s1 + $0x1e8] sm:$0xf]  ;;  %v2197_v38 = vor.u32 %v2564_v27, %v2196_v26 }
  0x58   : > { %1165 = vmatpush.bf16.msrb.mxu1 %v2017_v35  ;;  %v2477_v5 = vld [vmem:[%s3930_s1 + $0x44] sm:$0xf]  ;;  %v1854_v6 = vld [vmem:[%s3930_s1 + $0x50] sm:$0xf0]  ;;  %v1985_v8 = vor.u32 %v2509_v60, %v1982_v63  ;;  %v2496_v50 = vld [vmem:[%s3930_s1 + $0xd4] sm:$0xf0] }
  0x59   : > { %1184 = vmatpush.bf16.msrb.mxu2 %v2145_v31  ;;  %v2573_v7 = vld [vmem:[%s3930_s1 + $0x344] sm:$0xf]  ;;  %v2238_v9 = vld [vmem:[%s3930_s1 + $0x350] sm:$0xf0]  ;;  %v1857_v14 = vor.u32 %v2477_v5, %v1854_v6  ;;  %v2532_v31 = vld [vmem:[%s3930_s1 + $0x1f4] sm:$0xf0] }
  0x5a   : > { %1146 = vmatpush.bf16.msrb.mxu0 %v1889_v43  ;;  %1203 = vmatpush.bf16.msrb.mxu3 %v2273_v47  ;;  %v2537_v10 = vld [vmem:[%s3930_s1 + $0x224] sm:$0xf]  ;;  %v2094_v11 = vld [vmem:[%s3930_s1 + $0x230] sm:$0xf0]  ;;  %v2241_v16 = vor.u32 %v2573_v7, %v2238_v9  ;;  %v2069_v42 = vor.u32 %v2532_v31, %v2068_v30  ;;  %v2596_v43 = vld [vmem:[%s3930_s1 + $0x3f4] sm:$0xf0] }
  0x5b   : > { %1080 = vmatmul.bf16.gmra.mxu0 %v3165_v52  ;;  %1099 = vmatmul.bf16.gmra.mxu1 %v3176_v58  ;;  %v2505_v12 = vld [vmem:[%s3930_s1 + $0x124] sm:$0xf]  ;;  %v1966_v13 = vld [vmem:[%s3930_s1 + $0x130] sm:$0xf0]  ;;  %v2097_v17 = vor.u32 %v2537_v10, %v2094_v11  ;;  %v2325_v51 = vor.u32 %v2596_v43, %v2324_v41  ;;  %v2052_v54 = vld [vmem:[%s3930_s1 + $0x1c8] sm:$0xf] }
  0x5c   : > { %1166 = vmatpush.bf16.msrb.mxu1 %v2001_v53  ;;  %1118 = vmatmul.bf16.gmra.mxu2 %v3178_v59  ;;  %v2473_v15 = vld [vmem:[%s3930_s1 + $0x24] sm:$0xf]  ;;  %v1838_v18 = vld [vmem:[%s3930_s1 + $0x30] sm:$0xf0]  ;;  %v1969_v21 = vor.u32 %v2505_v12, %v1966_v13  ;;  %v2181_v53 = vor.u32 %v2560_v45, %v2180_v44  ;;  %v2528_v55 = vld [vmem:[%s3930_s1 + $0x1d4] sm:$0xf0] }
  0x5d   : > { %1185 = vmatpush.bf16.msrb.mxu2 %v2129_v48  ;;  %1137 = vmatmul.bf16.gmra.mxu3 %v3186_v0  ;;  %v2569_v19 = vld [vmem:[%s3930_s1 + $0x324] sm:$0xf]  ;;  %v2222_v20 = vld [vmem:[%s3930_s1 + $0x330] sm:$0xf0]  ;;  %v1841_v28 = vor.u32 %v2473_v15, %v1838_v18  ;;  %v1941_v48 = vor.u32 %v2500_v40, %v1940_v39  ;;  %v2308_v57 = vld [vmem:[%s3930_s1 + $0x3c8] sm:$0xf] }
  0x5e   : > { %1147 = vmatpush.bf16.msrb.mxu0 %v1873_v2  ;;  %1204 = vmatpush.bf16.msrb.mxu3 %v2257_v3  ;;  %v2533_v22 = vld [vmem:[%s3930_s1 + $0x204] sm:$0xf]  ;;  %v2078_v23 = vld [vmem:[%s3930_s1 + $0x210] sm:$0xf0]  ;;  %v2225_v32 = vor.u32 %v2569_v19, %v2222_v20  ;;  %v2592_v60 = vld [vmem:[%s3930_s1 + $0x3d4] sm:$0xf0]  ;;  %v1925_v3 = vor.u32 %v2496_v50, %v1924_v49 }
  0x5f   : > { %v2501_v24 = vld [vmem:[%s3930_s1 + $0x104] sm:$0xf]  ;;  %v1950_v25 = vld [vmem:[%s3930_s1 + $0x110] sm:$0xf0]  ;;  %v2081_v33 = vor.u32 %v2533_v22, %v2078_v23  ;;  %v2164_v63 = vld [vmem:[%s3930_s1 + $0x2a8] sm:$0xf]  ;;  %v2309_v7 = vor.u32 %v2592_v60, %v2308_v57 }
  0x60   : > { %1167 = vmatpush.bf16.msrb.mxu1 %v1985_v8  ;;  %v2469_v29 = vld [vmem:[%s3930_s1 + $0x4] sm:$0xf]  ;;  %v1822_v34 = vld [vmem:[%s3930_s1 + $0x10] sm:$0xf0]  ;;  %v1953_v37 = vor.u32 %v2501_v24, %v1950_v25  ;;  %v2556_v2 = vld [vmem:[%s3930_s1 + $0x2b4] sm:$0xf0] }
  0x61   : > { %1186 = vmatpush.bf16.msrb.mxu2 %v2113_v4  ;;  %v2565_v35 = vld [vmem:[%s3930_s1 + $0x304] sm:$0xf]  ;;  %v2206_v36 = vld [vmem:[%s3930_s1 + $0x310] sm:$0xf0]  ;;  %v1825_v46 = vor.u32 %v2469_v29, %v1822_v34  ;;  %v2053_v4 = vor.u32 %v2528_v55, %v2052_v54  ;;  %v1908_v5 = vld [vmem:[%s3930_s1 + $0xa8] sm:$0xf]  ;;  %v2165_v8 = vor.u32 %v2556_v2, %v2164_v63 }
  0x62   : > { %1148 = vmatpush.bf16.msrb.mxu0 %v1857_v14  ;;  %1205 = vmatpush.bf16.msrb.mxu3 %v2241_v16  ;;  %v2209_v47 = vor.u32 %v2565_v35, %v2206_v36  ;;  %v2492_v6 = vld [vmem:[%s3930_s1 + $0xb4] sm:$0xf0]  ;;  %v2036_v9 = vld [vmem:[%s3930_s1 + $0x1a8] sm:$0xf] }
  0x63   : > { %v2524_v10 = vld [vmem:[%s3930_s1 + $0x1b4] sm:$0xf0]  ;;  %v2292_v11 = vld [vmem:[%s3930_s1 + $0x3a8] sm:$0xf]  ;;  %v1909_v15 = vor.u32 %v2492_v6, %v1908_v5 }
  0x64   : > { %1168 = vmatpush.bf16.msrb.mxu1 %v1969_v21  ;;  %v2588_v12 = vld [vmem:[%s3930_s1 + $0x3b4] sm:$0xf0]  ;;  %v2148_v13 = vld [vmem:[%s3930_s1 + $0x288] sm:$0xf]  ;;  %v2037_v16 = vor.u32 %v2524_v10, %v2036_v9 }
  0x65   : > { %1187 = vmatpush.bf16.msrb.mxu2 %v2097_v17  ;;  %v2552_v14 = vld [vmem:[%s3930_s1 + $0x294] sm:$0xf0]  ;;  %v1892_v17 = vld [vmem:[%s3930_s1 + $0x88] sm:$0xf]  ;;  %v2293_v19 = vor.u32 %v2588_v12, %v2292_v11 }
  0x66   : > { %1149 = vmatpush.bf16.msrb.mxu0 %v1841_v28  ;;  %1206 = vmatpush.bf16.msrb.mxu3 %v2225_v32  ;;  %v2488_v18 = vld [vmem:[%s3930_s1 + $0x94] sm:$0xf0]  ;;  %v2149_v20 = vor.u32 %v2552_v14, %v2148_v13  ;;  %v2020_v21 = vld [vmem:[%s3930_s1 + $0x188] sm:$0xf] }
  0x67   : > { %v2520_v22 = vld [vmem:[%s3930_s1 + $0x194] sm:$0xf0]  ;;  %v2276_v23 = vld [vmem:[%s3930_s1 + $0x388] sm:$0xf]  ;;  %v1893_v27 = vor.u32 %v2488_v18, %v1892_v17 }
  0x68   : > { %1169 = vmatpush.bf16.msrb.mxu1 %v1953_v37  ;;  %v2584_v24 = vld [vmem:[%s3930_s1 + $0x394] sm:$0xf0]  ;;  %v2132_v25 = vld [vmem:[%s3930_s1 + $0x268] sm:$0xf]  ;;  %v2021_v28 = vor.u32 %v2520_v22, %v2020_v21  ;;  %v1942_v21 = vld [vmem:[%s3930_s1 + $0xf8] sm:$0xf0] }
  0x69   : > { %1188 = vmatpush.bf16.msrb.mxu2 %v2081_v33  ;;  %v2548_v26 = vld [vmem:[%s3930_s1 + $0x274] sm:$0xf0]  ;;  %v1876_v29 = vld [vmem:[%s3930_s1 + $0x68] sm:$0xf]  ;;  %v2277_v31 = vor.u32 %v2584_v24, %v2276_v23  ;;  %v2530_v22 = vld [vmem:[%s3930_s1 + $0x1ec] sm:$0xf] }
  0x6a   : > { %1150 = vmatpush.bf16.msrb.mxu0 %v1825_v46  ;;  %1207 = vmatpush.bf16.msrb.mxu3 %v2209_v47  ;;  %v2484_v30 = vld [vmem:[%s3930_s1 + $0x74] sm:$0xf0]  ;;  %v2133_v32 = vor.u32 %v2548_v26, %v2132_v25  ;;  %v2004_v33 = vld [vmem:[%s3930_s1 + $0x168] sm:$0xf]  ;;  %v2070_v23 = vld [vmem:[%s3930_s1 + $0x1f8] sm:$0xf0] }
  0x6b   : > { %1170 = vmatmul.bf16.vlgmr.msrb.gmra.mxu1 %v3060_v61  ;;  %v2516_v34 = vld [vmem:[%s3930_s1 + $0x174] sm:$0xf0]  ;;  %v2260_v35 = vld [vmem:[%s3930_s1 + $0x368] sm:$0xf]  ;;  %v1877_v39 = vor.u32 %v2484_v30, %v1876_v29  ;;  %v2594_v24 = vld [vmem:[%s3930_s1 + $0x3ec] sm:$0xf] }
  0x6c   : > { %1238 = vmatpush.bf16.msra.mxu1 %v2069_v42  ;;  %1189 = vmatmul.bf16.vlgmr.msrb.gmra.mxu2 %v3062_v62  ;;  %v2580_v36 = vld [vmem:[%s3930_s1 + $0x374] sm:$0xf0]  ;;  %v2116_v37 = vld [vmem:[%s3930_s1 + $0x248] sm:$0xf]  ;;  %v2005_v40 = vor.u32 %v2516_v34, %v2004_v33  ;;  %v2326_v25 = vld [vmem:[%s3930_s1 + $0x3f8] sm:$0xf0] }
  0x6d   : > { %1257 = vmatpush.bf16.msra.mxu2 %v2197_v38  ;;  %1151 = vmatmul.bf16.vlgmr.msrb.gmra.mxu0 %v3049_v56  ;;  %v2544_v38 = vld [vmem:[%s3930_s1 + $0x254] sm:$0xf0]  ;;  %v1860_v41 = vld [vmem:[%s3930_s1 + $0x48] sm:$0xf]  ;;  %v2261_v43 = vor.u32 %v2580_v36, %v2260_v35  ;;  %v2182_v29 = vld [vmem:[%s3930_s1 + $0x2d8] sm:$0xf0]  ;;  %v2329_v33 = vor.u32 %v2594_v24, %v2326_v25 }
  0x6e   : > { %1219 = vmatpush.bf16.msra.mxu0 %v1941_v48  ;;  %1276 = vmatpush.bf16.msra.mxu3 %v2325_v51  ;;  %v2480_v42 = vld [vmem:[%s3930_s1 + $0x54] sm:$0xf0]  ;;  %v2117_v44 = vor.u32 %v2544_v38, %v2116_v37  ;;  %v1988_v45 = vld [vmem:[%s3930_s1 + $0x148] sm:$0xf]  ;;  %v2494_v34 = vld [vmem:[%s3930_s1 + $0xcc] sm:$0xf] }
  0x6f   : > { %1208 = vmatmul.bf16.vlgmr.msrb.gmra.mxu3 %v3070_v1  ;;  %v2512_v46 = vld [vmem:[%s3930_s1 + $0x154] sm:$0xf0]  ;;  %v2244_v47 = vld [vmem:[%s3930_s1 + $0x348] sm:$0xf]  ;;  %v1861_v51 = vor.u32 %v2480_v42, %v1860_v41  ;;  %v1926_v35 = vld [vmem:[%s3930_s1 + $0xd8] sm:$0xf0] }
  0x70   : > { %1239 = vmatpush.bf16.msra.mxu1 %v2053_v4  ;;  %v2576_v48 = vld [vmem:[%s3930_s1 + $0x354] sm:$0xf0]  ;;  %v2100_v49 = vld [vmem:[%s3930_s1 + $0x228] sm:$0xf]  ;;  %v2526_v37 = vld [vmem:[%s3930_s1 + $0x1cc] sm:$0xf] }
  0x71   : > { %1258 = vmatpush.bf16.msra.mxu2 %v2181_v53  ;;  %v2540_v50 = vld [vmem:[%s3930_s1 + $0x234] sm:$0xf0]  ;;  %v1989_v53 = vor.u32 %v2512_v46, %v1988_v45  ;;  %v1844_v54 = vld [vmem:[%s3930_s1 + $0x28] sm:$0xf]  ;;  %v2245_v57 = vor.u32 %v2576_v48, %v2244_v47  ;;  %v2054_v38 = vld [vmem:[%s3930_s1 + $0x1d8] sm:$0xf0] }
  0x72   : > { %1220 = vmatpush.bf16.msra.mxu0 %v1925_v3  ;;  %1277 = vmatpush.bf16.msra.mxu3 %v2309_v7  ;;  %v2476_v55 = vld [vmem:[%s3930_s1 + $0x34] sm:$0xf0]  ;;  %v2101_v60 = vor.u32 %v2540_v50, %v2100_v49  ;;  %v1972_v63 = vld [vmem:[%s3930_s1 + $0x128] sm:$0xf]  ;;  %v2562_v7 = vld [vmem:[%s3930_s1 + $0x2ec] sm:$0xf]  ;;  %v2057_v46 = vor.u32 %v2526_v37, %v2054_v38 }
  0x73   : > { %v2508_v2 = vld [vmem:[%s3930_s1 + $0x134] sm:$0xf0]  ;;  %v2228_v3 = vld [vmem:[%s3930_s1 + $0x328] sm:$0xf]  ;;  %v1845_v9 = vor.u32 %v2476_v55, %v1844_v54  ;;  %v2310_v41 = vld [vmem:[%s3930_s1 + $0x3d8] sm:$0xf0] }
  0x74   : > { %1240 = vmatpush.bf16.msra.mxu1 %v2037_v16  ;;  %v2572_v4 = vld [vmem:[%s3930_s1 + $0x334] sm:$0xf0]  ;;  %v2084_v5 = vld [vmem:[%s3930_s1 + $0x208] sm:$0xf]  ;;  %v1973_v10 = vor.u32 %v2508_v2, %v1972_v63  ;;  %v2554_v42 = vld [vmem:[%s3930_s1 + $0x2ac] sm:$0xf] }
  0x75   : > { %1259 = vmatpush.bf16.msra.mxu2 %v2165_v8  ;;  %v2536_v6 = vld [vmem:[%s3930_s1 + $0x214] sm:$0xf0]  ;;  %v2198_v8 = vld [vmem:[%s3930_s1 + $0x2f8] sm:$0xf0]  ;;  %v1828_v11 = vld [vmem:[%s3930_s1 + $0x8] sm:$0xf]  ;;  %v2229_v14 = vor.u32 %v2572_v4, %v2228_v3 }
  0x76   : > { %1221 = vmatpush.bf16.msra.mxu0 %v1909_v15  ;;  %1278 = vmatpush.bf16.msra.mxu3 %v2293_v19  ;;  %v2472_v12 = vld [vmem:[%s3930_s1 + $0x14] sm:$0xf0]  ;;  %v1956_v13 = vld [vmem:[%s3930_s1 + $0x108] sm:$0xf]  ;;  %v2085_v15 = vor.u32 %v2536_v6, %v2084_v5  ;;  %v2201_v19 = vor.u32 %v2562_v7, %v2198_v8  ;;  %v1910_v45 = vld [vmem:[%s3930_s1 + $0xb8] sm:$0xf0] }
  0x77   : > { %v2504_v16 = vld [vmem:[%s3930_s1 + $0x114] sm:$0xf0]  ;;  %v2212_v17 = vld [vmem:[%s3930_s1 + $0x308] sm:$0xf]  ;;  %v1829_v26 = vor.u32 %v2472_v12, %v1828_v11  ;;  %v2522_v48 = vld [vmem:[%s3930_s1 + $0x1ac] sm:$0xf] }
  0x78   : > { %1241 = vmatpush.bf16.msra.mxu1 %v2021_v28  ;;  %v2568_v18 = vld [vmem:[%s3930_s1 + $0x314] sm:$0xf0]  ;;  %v2558_v28 = vld [vmem:[%s3930_s1 + $0x2cc] sm:$0xf]  ;;  %v2038_v49 = vld [vmem:[%s3930_s1 + $0x1b8] sm:$0xf0] }
  0x79   : > { %1260 = vmatpush.bf16.msra.mxu2 %v2149_v20  ;;  %v2498_v20 = vld [vmem:[%s3930_s1 + $0xec] sm:$0xf]  ;;  %v2213_v30 = vor.u32 %v2568_v18, %v2212_v17  ;;  %v2185_v36 = vor.u32 %v2558_v28, %v2182_v29  ;;  %v2294_v54 = vld [vmem:[%s3930_s1 + $0x3b8] sm:$0xf0]  ;;  %v2041_v2 = vor.u32 %v2522_v48, %v2038_v49 }
  0x7a   : > { %1222 = vmatpush.bf16.msra.mxu0 %v1893_v27  ;;  %1279 = vmatpush.bf16.msra.mxu3 %v2277_v31  ;;  %v1957_v27 = vor.u32 %v2504_v16, %v1956_v13  ;;  %v1945_v31 = vor.u32 %v2498_v20, %v1942_v21  ;;  %v2550_v55 = vld [vmem:[%s3930_s1 + $0x28c] sm:$0xf]  ;;  %v1894_v63 = vld [vmem:[%s3930_s1 + $0x98] sm:$0xf0] }
  0x7b   : > { %1175 = vmatmul.bf16.gmra.mxu1 %v3176_v58  ;;  %v2518_v4 = vld [vmem:[%s3930_s1 + $0x18c] sm:$0xf]  ;;  %v2022_v5 = vld [vmem:[%s3930_s1 + $0x198] sm:$0xf0] }
  0x7c   : > { %1242 = vmatpush.bf16.msra.mxu1 %v2005_v40  ;;  %1194 = vmatmul.bf16.gmra.mxu2 %v3178_v59  ;;  %v2590_v40 = vld [vmem:[%s3930_s1 + $0x3cc] sm:$0xf]  ;;  %v2134_v11 = vld [vmem:[%s3930_s1 + $0x278] sm:$0xf0] }
  0x7d   : > { %1261 = vmatpush.bf16.msra.mxu2 %v2133_v32  ;;  %1156 = vmatmul.bf16.gmra.mxu0 %v3165_v52  ;;  %v2073_v32 = vor.u32 %v2530_v22, %v2070_v23  ;;  %v2313_v47 = vor.u32 %v2590_v40, %v2310_v41  ;;  %v2582_v8 = vld [vmem:[%s3930_s1 + $0x38c] sm:$0xf]  ;;  %v1878_v13 = vld [vmem:[%s3930_s1 + $0x78] sm:$0xf0] }
  0x7e   : > { %1223 = vmatpush.bf16.msra.mxu0 %v1877_v39  ;;  %1280 = vmatpush.bf16.msra.mxu3 %v2261_v43  ;;  %v1929_v39 = vor.u32 %v2494_v34, %v1926_v35  ;;  %v2166_v43 = vld [vmem:[%s3930_s1 + $0x2b8] sm:$0xf0]  ;;  %v2482_v12 = vld [vmem:[%s3930_s1 + $0x6c] sm:$0xf] }
  0x7f   : > { %1213 = vmatmul.bf16.gmra.mxu3 %v3186_v0  ;;  %v2169_v50 = vor.u32 %v2554_v42, %v2166_v43  ;;  %v2514_v16 = vld [vmem:[%s3930_s1 + $0x16c] sm:$0xf]  ;;  %v2006_v17 = vld [vmem:[%s3930_s1 + $0x178] sm:$0xf0] }
  0x80   : > { %1243 = vmatpush.bf16.msra.mxu1 %v1989_v53  ;;  %v2586_v53 = vld [vmem:[%s3930_s1 + $0x3ac] sm:$0xf]  ;;  %v2262_v21 = vld [vmem:[%s3930_s1 + $0x378] sm:$0xf0] }
  0x81   : > { %1262 = vmatpush.bf16.msra.mxu2 %v2117_v44  ;;  %v2490_v44 = vld [vmem:[%s3930_s1 + $0xac] sm:$0xf]  ;;  %v2297_v3 = vor.u32 %v2586_v53, %v2294_v54  ;;  %v2118_v23 = vld [vmem:[%s3930_s1 + $0x258] sm:$0xf0] }
  0x82   : > { %1224 = vmatpush.bf16.msra.mxu0 %v1861_v51  ;;  %1281 = vmatpush.bf16.msra.mxu3 %v2245_v57  ;;  %v1913_v51 = vor.u32 %v2490_v44, %v1910_v45  ;;  %v2150_v57 = vld [vmem:[%s3930_s1 + $0x298] sm:$0xf0]  ;;  %v2578_v20 = vld [vmem:[%s3930_s1 + $0x36c] sm:$0xf] }
  0x83   : > { %v2153_v6 = vor.u32 %v2550_v55, %v2150_v57  ;;  %v2542_v22 = vld [vmem:[%s3930_s1 + $0x24c] sm:$0xf]  ;;  %v1862_v25 = vld [vmem:[%s3930_s1 + $0x58] sm:$0xf0] }
  0x84   : > { %1244 = vmatpush.bf16.msra.mxu1 %v1973_v10  ;;  %v2546_v10 = vld [vmem:[%s3930_s1 + $0x26c] sm:$0xf]  ;;  %v1990_v29 = vld [vmem:[%s3930_s1 + $0x158] sm:$0xf0] }
  0x85   : > { %1263 = vmatpush.bf16.msra.mxu2 %v2101_v60  ;;  %v2486_v60 = vld [vmem:[%s3930_s1 + $0x8c] sm:$0xf]  ;;  %v2137_v18 = vor.u32 %v2546_v10, %v2134_v11  ;;  %v2102_v35 = vld [vmem:[%s3930_s1 + $0x238] sm:$0xf0] }
  0x86   : > { %1225 = vmatpush.bf16.msra.mxu0 %v1845_v9  ;;  %1282 = vmatpush.bf16.msra.mxu3 %v2229_v14  ;;  %v1897_v7 = vor.u32 %v2486_v60, %v1894_v63  ;;  %v2278_v9 = vld [vmem:[%s3930_s1 + $0x398] sm:$0xf0]  ;;  %v2025_v14 = vor.u32 %v2518_v4, %v2022_v5  ;;  %v2478_v24 = vld [vmem:[%s3930_s1 + $0x4c] sm:$0xf] }
  0x87   : > { %v2510_v28 = vld [vmem:[%s3930_s1 + $0x14c] sm:$0xf]  ;;  %v1846_v37 = vld [vmem:[%s3930_s1 + $0x38] sm:$0xf0] }
  0x88   : > { %1245 = vmatpush.bf16.msra.mxu1 %v1957_v27  ;;  %v2265_v27 = vor.u32 %v2578_v20, %v2262_v21  ;;  %v2538_v34 = vld [vmem:[%s3930_s1 + $0x22c] sm:$0xf]  ;;  %v1993_v38 = vor.u32 %v2510_v28, %v1990_v29  ;;  %v1974_v41 = vld [vmem:[%s3930_s1 + $0x138] sm:$0xf0] }
  0x89   : > { %1264 = vmatpush.bf16.msra.mxu2 %v2085_v15  ;;  %v2281_v15 = vor.u32 %v2582_v8, %v2278_v9  ;;  %v2506_v40 = vld [vmem:[%s3930_s1 + $0x12c] sm:$0xf]  ;;  %v2105_v42 = vor.u32 %v2538_v34, %v2102_v35  ;;  %v2230_v45 = vld [vmem:[%s3930_s1 + $0x338] sm:$0xf0] }
  0x8a   : > { %1226 = vmatpush.bf16.msra.mxu0 %v1829_v26  ;;  %1283 = vmatpush.bf16.msra.mxu3 %v2213_v30  ;;  %v2009_v26 = vor.u32 %v2514_v16, %v2006_v17  ;;  %v2121_v30 = vor.u32 %v2542_v22, %v2118_v23  ;;  %v2570_v44 = vld [vmem:[%s3930_s1 + $0x32c] sm:$0xf]  ;;  %v1830_v49 = vld [vmem:[%s3930_s1 + $0x18] sm:$0xf0] }
  0x8b   : > { %1246 = vmatmul.bf16.vlgmr.msra.gmra.mxu1 %v3060_v61  ;;  %v2470_v48 = vld [vmem:[%s3930_s1 + $0xc] sm:$0xf]  ;;  %v1958_v57 = vld [vmem:[%s3930_s1 + $0x118] sm:$0xf0] }
  0x8c   : > { %1314 = vmatpush.bf16.msrb.mxu1 %v2073_v32  ;;  %1265 = vmatmul.bf16.vlgmr.msra.gmra.mxu2 %v3062_v62  ;;  %v2574_v32 = vld [vmem:[%s3930_s1 + $0x34c] sm:$0xf]  ;;  %v1833_v55 = vor.u32 %v2470_v48, %v1830_v49  ;;  %v2214_v63 = vld [vmem:[%s3930_s1 + $0x318] sm:$0xf0]  ;;  %v2609_v48 = vld [vmem:[%s3931_s2 + $0x64] sm:$0xf] }
  0x8d   : > { %1333 = vmatpush.bf16.msrb.mxu2 %v2201_v19  ;;  %1227 = vmatmul.bf16.vlgmr.msra.gmra.mxu0 %v3049_v56  ;;  %v1881_v19 = vor.u32 %v2482_v12, %v1878_v13  ;;  %v2502_v53 = vld [vmem:[%s3930_s1 + $0x10c] sm:$0xf] }
  0x8e   : > { %1295 = vmatpush.bf16.msrb.mxu0 %v1945_v31  ;;  %1352 = vmatpush.bf16.msrb.mxu3 %v2329_v33  ;;  %v1865_v31 = vor.u32 %v2478_v24, %v1862_v25  ;;  %v2246_v33 = vld [vmem:[%s3930_s1 + $0x358] sm:$0xf0]  ;;  %v2566_v60 = vld [vmem:[%s3930_s1 + $0x30c] sm:$0xf] }
  0x8f   : > { %1284 = vmatmul.bf16.vlgmr.msra.gmra.mxu3 %v3070_v1 }
  0x90   : > { %1315 = vmatpush.bf16.msrb.mxu1 %v2057_v46  ;;  %v2534_v46 = vld [vmem:[%s3930_s1 + $0x20c] sm:$0xf] }
  0x91   : > { %1334 = vmatpush.bf16.msrb.mxu2 %v2185_v36  ;;  %v2474_v36 = vld [vmem:[%s3930_s1 + $0x2c] sm:$0xf] }
  0x92   : > { %1296 = vmatpush.bf16.msrb.mxu0 %v1929_v39  ;;  %1353 = vmatpush.bf16.msrb.mxu3 %v2313_v47  ;;  %v2249_v39 = vor.u32 %v2574_v32, %v2246_v33  ;;  %v1849_v43 = vor.u32 %v2474_v36, %v1846_v37  ;;  %v2086_v47 = vld [vmem:[%s3930_s1 + $0x218] sm:$0xf0] }
  0x93   : > { %v2089_v54 = vor.u32 %v2534_v46, %v2086_v47  ;;  %v2380_v46 = vld [vmem:[%s3931_s2 + $0x60] sm:$0xf]  ;;  %v2610_v47 = vld [vmem:[%s3931_s2 + $0x64] sm:$0xf0] }
  0x94   : > { %1316 = vmatpush.bf16.msrb.mxu1 %v2041_v2  ;;  %v1961_v2 = vor.u32 %v2502_v53, %v1958_v57  ;;  %v2382_v53 = vld [vmem:[%s3931_s2 + $0x68] sm:$0xf0] }
  0x95   : > { %1335 = vmatpush.bf16.msrb.mxu2 %v2169_v50  ;;  %v1977_v50 = vor.u32 %v2506_v40, %v1974_v41  ;;  %v2388_v40 = vld [vmem:[%s3931_s2 + $0x70] sm:$0xf]  ;;  %v2612_v41 = vld [vmem:[%s3931_s2 + $0x74] sm:$0xf0] }
  0x96   : > { %1297 = vmatpush.bf16.msrb.mxu0 %v1913_v51  ;;  %1354 = vmatpush.bf16.msrb.mxu3 %v2297_v3  ;;  %v2233_v51 = vor.u32 %v2570_v44, %v2230_v45  ;;  %v2217_v3 = vor.u32 %v2566_v60, %v2214_v63  ;;  %v2390_v44 = vld [vmem:[%s3931_s2 + $0x78] sm:$0xf0]  ;;  %v2385_v60 = vor.u32 %v2609_v48, %v2382_v53  ;;  %v2597_v53 = vld [vmem:[%s3931_s2 + $0x4] sm:$0xf] }
  0x98   : > { %1317 = vmatpush.bf16.msrb.mxu1 %v2025_v14 }
  0x99   : > { %1336 = vmatpush.bf16.msrb.mxu2 %v2153_v6 }
  0x9a   : > { %1298 = vmatpush.bf16.msrb.mxu0 %v1897_v7  ;;  %1355 = vmatpush.bf16.msrb.mxu3 %v2281_v15 }
  0x9b   : > { %1251 = vmatmul.bf16.gmra.mxu1 %v3176_v58 }
  0x9c   : > { %1318 = vmatpush.bf16.msrb.mxu1 %v2009_v26  ;;  %1270 = vmatmul.bf16.gmra.mxu2 %v3178_v59 }
  0x9d   : > { %1337 = vmatpush.bf16.msrb.mxu2 %v2137_v18  ;;  %1232 = vmatmul.bf16.gmra.mxu0 %v3165_v52 }
  0x9e   : > { %1299 = vmatpush.bf16.msrb.mxu0 %v1881_v19  ;;  %1356 = vmatpush.bf16.msrb.mxu3 %v2265_v27 }
  0x9f   : > { %1289 = vmatmul.bf16.gmra.mxu3 %v3186_v0 }
  0xa0   : > { %1319 = vmatpush.bf16.msrb.mxu1 %v1993_v38 }
  0xa1   : > { %1338 = vmatpush.bf16.msrb.mxu2 %v2121_v30 }
  0xa2   : > { %1300 = vmatpush.bf16.msrb.mxu0 %v1865_v31  ;;  %1357 = vmatpush.bf16.msrb.mxu3 %v2249_v39 }
  0xa4   : > { %1320 = vmatpush.bf16.msrb.mxu1 %v1977_v50 }
  0xa5   : > { %1339 = vmatpush.bf16.msrb.mxu2 %v2105_v42  ;;  %v2611_v42 = vld [vmem:[%s3931_s2 + $0x74] sm:$0xf] }
  0xa6   : > { %1301 = vmatpush.bf16.msrb.mxu0 %v1849_v43  ;;  %1358 = vmatpush.bf16.msrb.mxu3 %v2233_v51  ;;  %v2389_v43 = vor.u32 %v2612_v41, %v2388_v40  ;;  %v2393_v45 = vor.u32 %v2611_v42, %v2390_v44  ;;  %v2381_v51 = vor.u32 %v2610_v47, %v2380_v46  ;;  %v2340_v41 = vld [vmem:[%s3931_s2 + $0x10] sm:$0xf]  ;;  %v2600_v42 = vld [vmem:[%s3931_s2 + $0x14] sm:$0xf0] }
  0xa7   : > { %v2341_v44 = vor.u32 %v2600_v42, %v2340_v41  ;;  %v2619_v42 = vld [vmem:[%s3931_s2 + $0xb4] sm:$0xf] }
  0xa8   : > { %1321 = vmatpush.bf16.msrb.mxu1 %v1961_v2 }
  0xa9   : > { %1340 = vmatpush.bf16.msrb.mxu2 %v2089_v54 }
  0xaa   : > { %1302 = vmatpush.bf16.msrb.mxu0 %v1833_v55  ;;  %1359 = vmatpush.bf16.msrb.mxu3 %v2217_v3  ;;  %v2372_v3 = vld [vmem:[%s3931_s2 + $0x50] sm:$0xf] }
  0xab   : > { %1322 = vmatmul.bf16.vlgmr.msrb.gmra.mxu1 %v3060_v61 }
  0xac   : > { %1341 = vmatmul.bf16.vlgmr.msrb.gmra.mxu2 %v3062_v62 }
  0xad   : > { %1303 = vmatmul.bf16.vlgmr.msrb.gmra.mxu0 %v3049_v56  ;;  %1621 = vmatpush.bf16.msra.mxu2 %v2393_v45  ;;  %v2342_v45 = vld [vmem:[%s3931_s2 + $0x18] sm:$0xf0] }
  0xae   : > { %1593 = vmatpush.bf16.msra.mxu0 %v2389_v43  ;;  %v2599_v43 = vld [vmem:[%s3931_s2 + $0x14] sm:$0xf] }
  0xaf   : > { %1360 = vmatmul.bf16.vlgmr.msrb.gmra.mxu3 %v3070_v1  ;;  %v2345_v48 = vor.u32 %v2599_v43, %v2342_v45  ;;  %v2422_v43 = vld [vmem:[%s3931_s2 + $0xb8] sm:$0xf0] }
  0xb0   : > { %v2425_v45 = vor.u32 %v2619_v42, %v2422_v43 }
  0xb1   : > { %1622 = vmatpush.bf16.msra.mxu2 %v2385_v60  ;;  %v2334_v60 = vld [vmem:[%s3931_s2 + $0x8] sm:$0xf0] }
  0xb2   : > { %1594 = vmatpush.bf16.msra.mxu0 %v2381_v51  ;;  %v2598_v51 = vld [vmem:[%s3931_s2 + $0x4] sm:$0xf0] }
  0xbb   : > { %1327 = vmatmul.bf16.gmra.mxu1 %v3176_v58 }
  0xbc   : > { %1346 = vmatmul.bf16.gmra.mxu2 %v3178_v59 }
  0xbd   : > { %1308 = vmatmul.bf16.gmra.mxu0 %v3165_v52 }
  0xbf   : > { %1365 = vmatmul.bf16.gmra.mxu3 %v3186_v0 }
  0xc8   : > { %v1076_v4 = vpop.f32.mrf.mxu0  ;;  %v1095_v5 = vpop.f32.mrf.mxu1 }
  0xc9   : > { %v1096_v6 = vadd.f32 %v1095_v5, %v1076_v4  ;;  %v2608_v4 = vld [vmem:[%s3931_s2 + $0x54] sm:$0xf0]  ;;  %v2607_v5 = vld [vmem:[%s3931_s2 + $0x54] sm:$0xf] }
  0xcf   : > { %v1114_v7 = vpop.f32.mrf.mxu2 }
  0xd0   : > { %v1115_v8 = vadd.f32 %v1114_v7, %v1096_v6  ;;  %v1133_v56 = vpop.f32.mrf.mxu3  ;;  %v1078_v9 = vpop.f32.mrf.mxu0  ;;  %v2373_v6 = vor.u32 %v2608_v4, %v2372_v3  ;;  %v2374_v7 = vld [vmem:[%s3931_s2 + $0x58] sm:$0xf0]  ;;  %v2337_v3 = vor.u32 %v2597_v53, %v2334_v60  ;;  %v2627_v4 = vld [vmem:[%s3931_s2 + $0xf4] sm:$0xf]  ;;  %v2617_v60 = vld [vmem:[%s3931_s2 + $0xa4] sm:$0xf] }
  0xd1   : > { %v1097_v61 = vpop.f32.mrf.mxu1 }
  0xd2   : > { %v1134_v10 = vadd.f32 %v1133_v56, %v1115_v8  ;;  %v1098_v62 = vadd.f32 %v1097_v61, %v1078_v9  ;;  %v2377_v8 = vor.u32 %v2607_v5, %v2374_v7  ;;  %1595 = vmatpush.bf16.msra.mxu0 %v2373_v6  ;;  %v2364_v56 = vld [vmem:[%s3931_s2 + $0x40] sm:$0xf]  ;;  %v2606_v9 = vld [vmem:[%s3931_s2 + $0x44] sm:$0xf0]  ;;  %v2605_v61 = vld [vmem:[%s3931_s2 + $0x44] sm:$0xf] }
  0xd3   : > { %v2454_v5 = vld [vmem:[%s3931_s2 + $0xf8] sm:$0xf0]  ;;  %v2452_v6 = vld [vmem:[%s3931_s2 + $0xf0] sm:$0xf] }
  0xd4   : > { %v3660_v20 = vmul.f32 %v1134_v10, %v1134_v10  ;;  %1623 = vmatpush.bf16.msra.mxu2 %v2377_v8  ;;  %v2457_v7 = vor.u32 %v2627_v4, %v2454_v5  ;;  %v2628_v8 = vld [vmem:[%s3931_s2 + $0xf4] sm:$0xf0] }
  0xd6   : > { %1635 = vmatpush.bf16.msra.mxu3 %v2457_v7 }
  0xd7   : > { %v1116_v11 = vpop.f32.mrf.mxu2 }
  0xd8   : > { %v1117_v1 = vadd.f32 %v1116_v11, %v1098_v62  ;;  %v1135_v12 = vpop.f32.mrf.mxu3  ;;  %v1081_v52 = vpop.f32.mrf.mxu0  ;;  %v2365_v11 = vor.u32 %v2606_v9, %v2364_v56  ;;  %v2453_v56 = vor.u32 %v2628_v8, %v2452_v6  ;;  %v2625_v9 = vld [vmem:[%s3931_s2 + $0xe4] sm:$0xf] }
  0xd9   : > { %v1100_v13 = vpop.f32.mrf.mxu1 }
  0xda   : > { %v1136_v58 = vadd.f32 %v1135_v12, %v1117_v1  ;;  %v1101_v14 = vadd.f32 %v1100_v13, %v1081_v52  ;;  %v2366_v1 = vld [vmem:[%s3931_s2 + $0x48] sm:$0xf0]  ;;  %1596 = vmatpush.bf16.msra.mxu0 %v2365_v11  ;;  %1607 = vmatpush.bf16.msra.mxu1 %v2453_v56 }
  0xdc   : > { %v3666_v30 = vmul.f32 %v1136_v58, %v1136_v58  ;;  %v2369_v58 = vor.u32 %v2605_v61, %v2366_v1  ;;  %v2446_v61 = vld [vmem:[%s3931_s2 + $0xe8] sm:$0xf0] }
  0xdd   : > { %v2449_v1 = vor.u32 %v2625_v9, %v2446_v61 }
  0xde   : > { %1624 = vmatpush.bf16.msra.mxu2 %v2369_v58 }
  0xdf   : > { %v1119_v59 = vpop.f32.mrf.mxu2  ;;  %1636 = vmatpush.bf16.msra.mxu3 %v2449_v1  ;;  %v2615_v1 = vld [vmem:[%s3931_s2 + $0x94] sm:$0xf] }
  0xe0   : > { %v1120_v15 = vadd.f32 %v1119_v59, %v1101_v14  ;;  %v1138_v0 = vpop.f32.mrf.mxu3  ;;  %v1083_v16 = vpop.f32.mrf.mxu0 }
  0xe1   : > { %v1102_v17 = vpop.f32.mrf.mxu1 }
  0xe2   : > { %v1139_v18 = vadd.f32 %v1138_v0, %v1120_v15  ;;  %v1103_v19 = vadd.f32 %v1102_v17, %v1083_v16  ;;  %v2356_v15 = vld [vmem:[%s3931_s2 + $0x30] sm:$0xf]  ;;  %v2604_v0 = vld [vmem:[%s3931_s2 + $0x34] sm:$0xf0]  ;;  %v2603_v16 = vld [vmem:[%s3931_s2 + $0x34] sm:$0xf] }
  0xe3   : > { %v2357_v17 = vor.u32 %v2604_v0, %v2356_v15  ;;  %v2436_v15 = vld [vmem:[%s3931_s2 + $0xd0] sm:$0xf] }
  0xe4   : > { %v3662_v21 = vmul.f32 %v1139_v18, %v1139_v18  ;;  %v2358_v18 = vld [vmem:[%s3931_s2 + $0x38] sm:$0xf0] }
  0xe5   : > { %1597 = vmatpush.bf16.msra.mxu0 %v2357_v17 }
  0xe6   : > { %v1387_v22 = vsub.f32 %v3660_v20, %v3662_v21 }
  0xe7   : > { %v1121_v23 = vpop.f32.mrf.mxu2 }
  0xe8   : > { %v1122_v24 = vadd.f32 %v1121_v23, %v1103_v19  ;;  %v1140_v25 = vpop.f32.mrf.mxu3 }
  0xe9   : > { %v1171_v27 = vpop.f32.mrf.mxu1 }
  0xea   : > { %v1152_v26 = vpop.f32.mrf.mxu0  ;;  %v1141_v28 = vadd.f32 %v1140_v25, %v1122_v24  ;;  %v2361_v24 = vor.u32 %v2603_v16, %v2358_v18  ;;  %v2624_v16 = vld [vmem:[%s3931_s2 + $0xd4] sm:$0xf0] }
  0xeb   : > { %v1172_v29 = vadd.f32 %v1171_v27, %v1152_v26  ;;  %v2348_v26 = vld [vmem:[%s3931_s2 + $0x20] sm:$0xf]  ;;  %v2602_v27 = vld [vmem:[%s3931_s2 + $0x24] sm:$0xf0]  ;;  %v2437_v18 = vor.u32 %v2624_v16, %v2436_v15  ;;  %v2613_v16 = vld [vmem:[%s3931_s2 + $0x84] sm:$0xf] }
  0xec   : > { %v3668_v31 = vmul.f32 %v1141_v28, %v1141_v28  ;;  %1625 = vmatpush.bf16.msra.mxu2 %v2361_v24  ;;  %v2601_v28 = vld [vmem:[%s3931_s2 + $0x24] sm:$0xf] }
  0xee   : > { %v1391_v32 = vsub.f32 %v3666_v30, %v3668_v31 }
  0xef   : > { %v1190_v33 = vpop.f32.mrf.mxu2 }
  0xf0   : > { %v1191_v35 = vadd.f32 %v1190_v33, %v1172_v29 }
  0xf1   : > { %v1173_v37 = vpop.f32.mrf.mxu1 }
  0xf2   : > { %v1209_v34 = vpop.f32.mrf.mxu3  ;;  %v1154_v36 = vpop.f32.mrf.mxu0 }
  0xf3   : > { %v1174_v38 = vadd.f32 %v1173_v37, %v1154_v36  ;;  %v1210_v39 = vadd.f32 %v1209_v34, %v1191_v35  ;;  %v2349_v34 = vor.u32 %v2602_v27, %v2348_v26  ;;  %v2350_v35 = vld [vmem:[%s3931_s2 + $0x28] sm:$0xf0]  ;;  %v2621_v26 = vld [vmem:[%s3931_s2 + $0xc4] sm:$0xf] }
  0xf4   : > { %v2430_v27 = vld [vmem:[%s3931_s2 + $0xc8] sm:$0xf0] }
  0xf5   : > { %v3732_v19 = vmul.f32 %v1210_v39, %v1210_v39  ;;  %v2353_v39 = vor.u32 %v2601_v28, %v2350_v35  ;;  %1598 = vmatpush.bf16.msra.mxu0 %v2349_v34  ;;  %v2428_v28 = vld [vmem:[%s3931_s2 + $0xc0] sm:$0xf]  ;;  %v2433_v34 = vor.u32 %v2621_v26, %v2430_v27  ;;  %v2622_v35 = vld [vmem:[%s3931_s2 + $0xc4] sm:$0xf0] }
  0xf7   : > { %v1192_v49 = vpop.f32.mrf.mxu2  ;;  %1626 = vmatpush.bf16.msra.mxu2 %v2353_v39  ;;  %v2429_v39 = vor.u32 %v2622_v35, %v2428_v28  ;;  %v2614_v28 = vld [vmem:[%s3931_s2 + $0x84] sm:$0xf0] }
  0xf8   : > { %v1193_v54 = vadd.f32 %v1192_v49, %v1174_v38 }
  0xf9   : > { %v1176_v57 = vpop.f32.mrf.mxu1  ;;  %1599 = vmatpush.bf16.msra.mxu0 %v2341_v44  ;;  %v2420_v44 = vld [vmem:[%s3931_s2 + $0xb0] sm:$0xf] }
  0xfa   : > { %v1211_v50 = vpop.f32.mrf.mxu3  ;;  %v1157_v55 = vpop.f32.mrf.mxu0 }
  0xfb   : > { %v1177_v63 = vadd.f32 %v1176_v57, %v1157_v55  ;;  %v1212_v2 = vadd.f32 %v1211_v50, %v1193_v54  ;;  %1627 = vmatpush.bf16.msra.mxu2 %v2345_v48  ;;  %v2332_v50 = vld [vmem:[%s3931_s2] sm:$0xf]  ;;  %v2620_v48 = vld [vmem:[%s3931_s2 + $0xb4] sm:$0xf0] }
  0xfc   : > { %v2333_v57 = vor.u32 %v2598_v51, %v2332_v50  ;;  %v2421_v53 = vor.u32 %v2620_v48, %v2420_v44 }
  0xfd   : > { %v3762_v46 = vmul.f32 %v1212_v2, %v1212_v2 }
  0xfe   : > { %1600 = vmatpush.bf16.msra.mxu0 %v2333_v57 }
  0xff   : > { %v1195_v10 = vpop.f32.mrf.mxu2  ;;  %1628 = vmatpush.bf16.msra.mxu2 %v2337_v3 }
 0x100   : > { %v1196_v12 = vadd.f32 %v1195_v10, %v1177_v63  ;;  %v2444_v10 = vld [vmem:[%s3931_s2 + $0xe0] sm:$0xf] }
 0x101   : > { %v1178_v13 = vpop.f32.mrf.mxu1 }
 0x102   : > { %v1214_v62 = vpop.f32.mrf.mxu3  ;;  %v1159_v52 = vpop.f32.mrf.mxu0 }
 0x103   : > { %v1179_v14 = vadd.f32 %v1178_v13, %v1159_v52  ;;  %v1215_v59 = vadd.f32 %v1214_v62, %v1196_v12  ;;  %v2626_v12 = vld [vmem:[%s3931_s2 + $0xe4] sm:$0xf0] }
 0x104   : > { %v2445_v58 = vor.u32 %v2626_v12, %v2444_v10  ;;  %v2406_v12 = vld [vmem:[%s3931_s2 + $0x98] sm:$0xf0] }
 0x105   : > { %v3734_v23 = vmul.f32 %v1215_v59, %v1215_v59  ;;  %v2438_v59 = vld [vmem:[%s3931_s2 + $0xd8] sm:$0xf0] }
 0x106   : > { %1608 = vmatpush.bf16.msra.mxu1 %v2445_v58 }
 0x107   : > { %v1388_v25 = vsub.f32 %v3732_v19, %v3734_v23  ;;  %v1197_v29 = vpop.f32.mrf.mxu2  ;;  %v246_v19 = vlaneseq }
 0x108   : > { %v1198_v36 = vadd.f32 %v1197_v29, %v1179_v14  ;;  %v2623_v14 = vld [vmem:[%s3931_s2 + $0xd4] sm:$0xf] }
 0x109   : > { %v1247_v38 = vpop.f32.mrf.mxu1  ;;  %v2441_v0 = vor.u32 %v2623_v14, %v2438_v59  ;;  %vm3897_vm0 = vcmp.lt.s32.totalorder %v246_v19, 256 }
 0x10a   : > { %v1216_v33 = vpop.f32.mrf.mxu3  ;;  %v1228_v37 = vpop.f32.mrf.mxu0  ;;  %1609 = vmatpush.bf16.msra.mxu1 %v2437_v18  ;;  %v2396_v18 = vld [vmem:[%s3931_s2 + $0x80] sm:$0xf] }
 0x10b   : > { %v1217_v40 = vadd.f32 %v1216_v33, %v1198_v36  ;;  %1637 = vmatpush.bf16.msra.mxu3 %v2441_v0  ;;  %v1248_v24 = vadd.f32 %v1247_v38, %v1228_v37 }
 0x10d   : > { %v3764_v47 = vmul.f32 %v1217_v40, %v1217_v40 }
 0x10e   : > { %1610 = vmatpush.bf16.msra.mxu1 %v2429_v39 }
 0x10f   : > { %v1392_v49 = vsub.f32 %v3762_v46, %v3764_v47  ;;  %v1266_v54 = vpop.f32.mrf.mxu2  ;;  %1638 = vmatpush.bf16.msra.mxu3 %v2433_v34 }
 0x110   : > { %v1267_v40 = vadd.f32 %v1266_v54, %v1248_v24 }
 0x111   : > { %v1249_v2 = vpop.f32.mrf.mxu1 }
 0x112   : > { %v1285_v55 = vpop.f32.mrf.mxu3  ;;  %v1230_v63 = vpop.f32.mrf.mxu0  ;;  %1611 = vmatpush.bf16.msra.mxu1 %v2421_v53 }
 0x113   : > { %v1250_v41 = vadd.f32 %v1249_v2, %v1230_v63  ;;  %1639 = vmatpush.bf16.msra.mxu3 %v2425_v45  ;;  %v1286_v54 = vadd.f32 %v1285_v55, %v1267_v40  ;;  %v2414_v63 = vld [vmem:[%s3931_s2 + $0xa8] sm:$0xf0]  ;;  %v2412_v2 = vld [vmem:[%s3931_s2 + $0xa0] sm:$0xf]  ;;  %v2618_v55 = vld [vmem:[%s3931_s2 + $0xa4] sm:$0xf0] }
 0x114   : > { %v2417_v5 = vor.u32 %v2617_v60, %v2414_v63  ;;  %v2413_v61 = vor.u32 %v2618_v55, %v2412_v2 }
 0x115   : > { %v1373_v10 = vmul.f32 %v1286_v54, %v1286_v54 }
 0x116   : > { %1612 = vmatpush.bf16.msra.mxu1 %v2413_v61 }
 0x117   : > { %v1268_v62 = vpop.f32.mrf.mxu2  ;;  %1640 = vmatpush.bf16.msra.mxu3 %v2417_v5 }
 0x118   : > { %v1269_v50 = vadd.f32 %v1268_v62, %v1250_v41 }
 0x119   : > { %v1252_v13 = vpop.f32.mrf.mxu1 }
 0x11a   : > { %v1287_v11 = vpop.f32.mrf.mxu3  ;;  %v1233_v52 = vpop.f32.mrf.mxu0 }
 0x11b   : > { %v1253_v17 = vadd.f32 %v1252_v13, %v1233_v52  ;;  %v1288_v6 = vadd.f32 %v1287_v11, %v1269_v50  ;;  %v2404_v11 = vld [vmem:[%s3931_s2 + $0x90] sm:$0xf]  ;;  %v2409_v52 = vor.u32 %v2615_v1, %v2406_v12  ;;  %v2616_v13 = vld [vmem:[%s3931_s2 + $0x94] sm:$0xf0] }
 0x11c   : > { %v2405_v15 = vor.u32 %v2616_v13, %v2404_v11 }
 0x11d   : > { %v1377_v58 = vmul.f32 %v1288_v6, %v1288_v6  ;;  %1641 = vmatpush.bf16.msra.mxu3 %v2409_v52 }
 0x11e   : > { %1613 = vmatpush.bf16.msra.mxu1 %v2405_v15 }
 0x11f   : > { %v1271_v29 = vpop.f32.mrf.mxu2 }
 0x120   : > { %v1272_v36 = vadd.f32 %v1271_v29, %v1253_v17  ;;  %v2398_v17 = vld [vmem:[%s3931_s2 + $0x88] sm:$0xf0] }
 0x121   : > { %v1254_v38 = vpop.f32.mrf.mxu1  ;;  %v2401_v27 = vor.u32 %v2613_v16, %v2398_v17 }
 0x122   : > { %v1290_v33 = vpop.f32.mrf.mxu3  ;;  %v1235_v37 = vpop.f32.mrf.mxu0 }
 0x123   : > { %v1291_v51 = vadd.f32 %v1290_v33, %v1272_v36  ;;  %v1255_v57 = vadd.f32 %v1254_v38, %v1235_v37  ;;  %v2397_v36 = vor.u32 %v2614_v28, %v2396_v18  ;;  %1642 = vmatpush.bf16.msra.mxu3 %v2401_v27 }
 0x125   : > { %v1381_v7 = vmul.f32 %v1291_v51, %v1291_v51  ;;  %1614 = vmatpush.bf16.msra.mxu1 %v2397_v36 }
 0x127   : > { %v1273_v3 = vpop.f32.mrf.mxu2  ;;  %v1389_v14 = vsub.f32 %v1373_v10, %v1381_v7 }
 0x128   : > { %v1274_v8 = vadd.f32 %v1273_v3, %v1255_v57 }
 0x129   : > { %v1323_v9 = vpop.f32.mrf.mxu1  ;;  %v1395_v29 = vadd.f32 %v1389_v14, %v1387_v22 }
 0x12a   : > { %v1292_v4 = vpop.f32.mrf.mxu3  ;;  %v1304_v56 = vpop.f32.mrf.mxu0 }
 0x12b   : > { %v1293_v62 = vadd.f32 %v1292_v4, %v1274_v8  ;;  %v1324_v43 = vadd.f32 %v1323_v9, %v1304_v56 }
 0x12d   : > { %v1385_v59 = vmul.f32 %v1293_v62, %v1293_v62 }
 0x12f   : > { %v1393_v0 = vsub.f32 %v1377_v58, %v1385_v59  ;;  %v1342_v24 = vpop.f32.mrf.mxu2 }
 0x130   : > { %v1343_v44 = vadd.f32 %v1342_v24, %v1324_v43 }
 0x131   : > { %v1397_v33 = vadd.f32 %v1393_v0, %v1391_v32  ;;  %v1325_v35 = vpop.f32.mrf.mxu1 }
 0x132   : > { %v1361_v26 = vpop.f32.mrf.mxu3  ;;  %v1306_v34 = vpop.f32.mrf.mxu0 }
 0x133   : > { %v1399_v37 = vpack.c.bf16 %v1397_v33, %v1395_v29  ;;  %v1326_v30 = vadd.f32 %v1325_v35, %v1306_v34  ;;  %v1362_v50 = vadd.f32 %v1361_v26, %v1343_v44 }
 0x135   : > { %1601 = vmatmul.bf16.vlgmr.msra.gmra.mxu0 %v1399_v37  ;;  %1629 = vmatmul.bf16.vlgmr.msra.gmra.mxu2 %v1399_v37  ;;  %v1374_v2 = vmul.f32 %v1362_v50, %v1362_v50 }
 0x137   : > { %v1344_v38 = vpop.f32.mrf.mxu2 }
 0x138   : > { %v1345_v45 = vadd.f32 %v1344_v38, %v1326_v30 }
 0x139   : > { %v1328_v41 = vpop.f32.mrf.mxu1 }
 0x13a   : > { %v1363_v39 = vpop.f32.mrf.mxu3  ;;  %v1309_v40 = vpop.f32.mrf.mxu0 }
 0x13b   : > { %v1329_v42 = vadd.f32 %v1328_v41, %v1309_v40  ;;  %v1364_v54 = vadd.f32 %v1363_v39, %v1345_v45 }
 0x13d   : > { %v1378_v4 = vmul.f32 %v1364_v54, %v1364_v54 }
 0x13f   : > { %v1347_v20 = vpop.f32.mrf.mxu2 }
 0x140   : > { %v1348_v22 = vadd.f32 %v1347_v20, %v1329_v42 }
 0x141   : > { %v1330_v32 = vpop.f32.mrf.mxu1 }
 0x142   : > { %v1366_v21 = vpop.f32.mrf.mxu3  ;;  %v1311_v31 = vpop.f32.mrf.mxu0 }
 0x143   : > { %v1367_v48 = vadd.f32 %v1366_v21, %v1348_v22  ;;  %v1331_v51 = vadd.f32 %v1330_v32, %v1311_v31 }
 0x145   : > { %v1382_v57 = vmul.f32 %v1367_v48, %v1367_v48 }
 0x147   : > { %v1349_v53 = vpop.f32.mrf.mxu2  ;;  %v1390_v5 = vsub.f32 %v1374_v2, %v1382_v57 }
 0x148   : > { %v1350_v60 = vadd.f32 %v1349_v53, %v1331_v51 }
 0x149   : > { %v1396_v7 = vadd.f32 %v1390_v5, %v1388_v25  ;;  %v2742_v25 = vmov 0.0  }
 0x14a   : > { %v1368_v63 = vpop.f32.mrf.mxu3  ;;  %250 = vst.msk [vmem:[%s3895_s28] sm:$0x3] %vm3897_vm0, %v2742_v25 }
 0x14b   : > { %v1369_v3 = vadd.f32 %v1368_v63, %v1350_v60 }
 0x14d   : > { %v1386_v55 = vmul.f32 %v1369_v3, %v1369_v3 }
 0x14f   : > { %v1394_v6 = vsub.f32 %v1378_v4, %v1386_v55 }
 0x151   : > { %v1398_v8 = vadd.f32 %v1394_v6, %v1392_v49  ;;  %v1649_v38 = vld [vmem:[%s3895_s28] sm:$0x3] }
 0x153   : > { %v1400_v56 = vpack.c.bf16 %v1398_v8, %v1396_v7 }
 0x155   : > { %1615 = vmatmul.bf16.vlgmr.msra.gmra.mxu1 %v1400_v56  ;;  %1643 = vmatmul.bf16.vlgmr.msra.gmra.mxu3 %v1400_v56 }
 0x1b2   : > { %v1602_v46 = vpop.f32.mrf.mxu0 }
 0x1b8   : > { %v1630_v49 = vpop.f32.mrf.mxu2 }
 0x1ba   : > { %v1604_v10 = vpop.f32.mrf.mxu0 }
 0x1c0   : > { %v1632_v58 = vpop.f32.mrf.mxu2 }
 0x1d2   : > { %v1616_v47 = vpop.f32.mrf.mxu1 }
 0x1d3   : > { %v1617_v61 = vadd.f32 %v1616_v47, %v1602_v46 }
 0x1d5   : > { %v1650_v12 = vand.u32 2147483647, %v1617_v61 }
 0x1d8   : > { %v1644_v9 = vpop.f32.mrf.mxu3 }
 0x1d9   : > { %v1645_v52 = vadd.f32 %v1644_v9, %v1630_v49 }
 0x1da   : > { %v1618_v62 = vpop.f32.mrf.mxu1 }
 0x1db   : > { %v1619_v1 = vadd.f32 %v1618_v62, %v1604_v10  ;;  %v1651_v0 = vand.u32 2147483647, %v1645_v52 }
 0x1dd   : > { %v1652_v11 = vand.u32 2147483647, %v1619_v1 }
 0x1df   : > { %v1654_v13 = vadd.f32 %v1652_v11, %v1650_v12 }
 0x1e0   : > { %v1646_v14 = vpop.f32.mrf.mxu3 }
 0x1e1   : > { %v1655_v59 = vrot.slane %v1654_v13, 4  ;;  %v1647_v15 = vadd.f32 %v1646_v14, %v1632_v58 }
 0x1e3   : > { %v1656_v16 = vadd.f32 %v1655_v59, %v1654_v13  ;;  %v1653_v17 = vand.u32 2147483647, %v1647_v15 }
 0x1e5   : > { %v1661_v18 = vadd.f32 %v1653_v17, %v1651_v0  ;;  %v1657_v24 = vrot.slane %v1656_v16, 2 }
 0x1e7   : > { %v1662_v26 = vrot.slane %v1661_v18, 4  ;;  %v1658_v28 = vadd.f32 %v1657_v24, %v1656_v16 }
 0x1e9   : > { %v1663_v27 = vadd.f32 %v1662_v26, %v1661_v18  ;;  %v1659_v34 = vrot.slane %v1658_v28, 1 }
 0x1eb   : > { %v1664_v29 = vrot.slane %v1663_v27, 2  ;;  %v1660_v37 = vadd.f32 %v1659_v34, %v1658_v28 }
 0x1ed   : > { %v1665_v33 = vadd.f32 %v1664_v29, %v1663_v27 }
 0x1ef   : > { %v1666_v35 = vrot.slane %v1665_v33, 1 }
 0x1f1   : > { %v1667_v36 = vadd.f32 %v1666_v35, %v1665_v33 }
 0x1f3   : > { %v1670_v39 = vrot.slane %v1667_v36, 7 }
 0x1f5   : > { %v1672_v40 = vsel %vm1671_vm1, %v1660_v37, %v1670_v39 }
 0x1f6   : > { %v1674_v41 = vadd.f32 %v1672_v40, %v1649_v38 }
 0x1f8   : > { %1679 = vst.msk [vmem:[%s3895_s28] sm:$0x3] %vm3897_vm0, %v1674_v41 }
 0x1f9 PF: > { %s13_s18 = sadd.s32 1, %s2740_s18   ;;  %s3935_s12 = smov %s2720_s13 }
 0x1fa   : > { %p10_p12 = scmp.ge.s32.totalorder %s13_s18, 6   ;;  %s3936_s13 = smov %s2814_s25 }
 0x1fb   : > { %s3937_s14 = smov %s2732_s16  ;;  %s3938_s15 = smov %s2736_s17 }
 0x1fc   : > { %s3939_s16 = smov %s3942_s19  ;;  %s3940_s17 = smov %s3946_s20 }
 0x1fd   :  { %12 = sbr.rel (!%p10_p12) target bundleno = 4 (0x4), region = 94 }

</bundles_post_ra>
